<compile_context>
chip_gen: v7x
topology: tpu7x:2x2x1
jax: 0.10.0
libtpu: 0.0.40
codegen_flags: <defaults>
</compile_context>

<pallas_src>
import functools

import jax
import jax.numpy as jnp
from jax.experimental import pallas as pl
from jax.experimental.pallas import tpu as pltpu


_VMEM = pl.BlockSpec(memory_space=pltpu.MemorySpace.VMEM)
_SMEM = pl.BlockSpec(memory_space=pltpu.MemorySpace.SMEM)


# ----------------------------------------------------------------------------
# Pallas kernels
# ----------------------------------------------------------------------------
def _dual_conv_kernel(x1t_ref, x2t_ref, w1_ref, w2_ref, b_ref, o_ref):
    # x*t: (K, M) transposed im2col patches, w*: (OC, K), b: (2, OC, 1), o: (2, OC, M)
    # Both towers' conv (as matmul) + bias + ReLU fused in one launch; output is
    # channel-major so the big M = N*oh*ow dimension is lane-dense.
    y1 = jnp.dot(w1_ref[...], x1t_ref[...], preferred_element_type=jnp.float32)
    y2 = jnp.dot(w2_ref[...], x2t_ref[...], preferred_element_type=jnp.float32)
    o_ref[0] = jnp.maximum(y1 + b_ref[0], 0.0)
    o_ref[1] = jnp.maximum(y2 + b_ref[1], 0.0)


def pallas_dual_conv(x1t, x2t, w1, w2, b):
    _, m = x1t.shape
    oc = w1.shape[0]
    return pl.pallas_call(
        _dual_conv_kernel,
        out_shape=jax.ShapeDtypeStruct((2, oc, m), jnp.float32),
        in_specs=[_VMEM, _VMEM, _VMEM, _VMEM, _VMEM],
        out_specs=_VMEM,
    )(x1t, x2t, w1, w2, b)


def _cross_stitch_kernel(x_ref, a_ref, o_ref):
    # x: (2, C, L) tower-stacked channel-major, a: (4, C, 1) = [a11, a12, a21, a22]
    # Single grid step over the whole batch; L (= N*H*W) is the lane dimension.
    x1 = x_ref[0]
    x2 = x_ref[1]
    o_ref[0] = a_ref[0] * x1 + a_ref[1] * x2
    o_ref[1] = a_ref[2] * x1 + a_ref[3] * x2


def pallas_cross_stitch(x_cm, alphas):
    return pl.pallas_call(
        _cross_stitch_kernel,
        out_shape=jax.ShapeDtypeStruct(x_cm.shape, jnp.float32),
        in_specs=[_VMEM, _VMEM],
        out_specs=_VMEM,
    )(x_cm, alphas)


def _dual_fc_cs_kernel(x_ref, w1_ref, w2_ref, b_ref, a_ref, o_ref, *, apply_relu):
    # x: (2, B, K), w*: (K, N), b: (2, 1, N), a: SMEM (4,) scalars, o: (2, B, N)
    # Linear (both towers) + bias + cross-stitch mix (+ following ReLU module) fused.
    y1 = jnp.dot(x_ref[0], w1_ref[...], preferred_element_type=jnp.float32) + b_ref[0]
    y2 = jnp.dot(x_ref[1], w2_ref[...], preferred_element_type=jnp.float32) + b_ref[1]
    o1 = a_ref[0] * y1 + a_ref[1] * y2
    o2 = a_ref[2] * y1 + a_ref[3] * y2
    if apply_relu:
        o1 = jnp.maximum(o1, 0.0)
        o2 = jnp.maximum(o2, 0.0)
    o_ref[0] = o1
    o_ref[1] = o2


def pallas_dual_fc_cs(x_cat, w1, w2, b_cat, alphas4, *, apply_relu):
    _, bsz, _ = x_cat.shape
    n_out = w1.shape[1]
    kernel = functools.partial(_dual_fc_cs_kernel, apply_relu=apply_relu)
    return pl.pallas_call(
        kernel,
        out_shape=jax.ShapeDtypeStruct((2, bsz, n_out), jnp.float32),
        in_specs=[_VMEM, _VMEM, _VMEM, _VMEM, _SMEM],
        out_specs=_VMEM,
    )(x_cat, w1, w2, b_cat, alphas4)


# ----------------------------------------------------------------------------
# Plain-JAX glue (patch extraction / pooling / layout plumbing)
# ----------------------------------------------------------------------------
def _im2col_t(x, kh=3, kw=3, stride=1, pad=1):
    # x: (N, C, H, W) -> transposed patches (Kp, N*oh*ow), Kp = C*kh*kw padded to mult of 8.
    x = jnp.pad(x, ((0, 0), (0, 0), (pad, pad), (pad, pad)))
    n, c, h, w = x.shape
    oh = (h - kh) // stride + 1
    ow = (w - kw) // stride + 1
    patches = []
    for i in range(kh):
        for j in range(kw):
            patches.append(x[:, :, i:i + oh * stride:stride, j:j + ow * stride:stride])
    p = jnp.stack(patches, axis=2)                               # (n, c, kh*kw, oh, ow)
    p = p.transpose(0, 3, 4, 1, 2).reshape(n * oh * ow, c * kh * kw)
    k = c * kh * kw
    kp = -(-k // 8) * 8
    if kp != k:
        p = jnp.pad(p, ((0, 0), (0, kp - k)))
    return p.T, oh, ow


def _maxpool2_cm(f, n, h, w):
    # TODO(synk): 2x2 max-pool kept as plain-JAX reshape+max glue (no clean single
    # Pallas lowering for strided-window pooling at these tiny shapes).
    t, c, _ = f.shape
    f = f.reshape(t, c, n, h // 2, 2, w // 2, 2).max(axis=(4, 6))
    return f.reshape(t, c, n * (h // 2) * (w // 2))


# ----------------------------------------------------------------------------
# Parameters
# ----------------------------------------------------------------------------
_ALPHA_KEEP = 0.9


def _cross_stitch_params(channels):
    unit = jnp.array([[_ALPHA_KEEP, 1.0 - _ALPHA_KEEP],
                      [1.0 - _ALPHA_KEEP, _ALPHA_KEEP]], dtype=jnp.float32)
    return jnp.tile(unit[None, :, :], (channels, 1, 1))


def init_tower_params(key):
    ks = jax.random.split(key, 8)
    f32 = jnp.float32
    return {
        "conv1_w": 0.10 * jax.random.normal(ks[0], (8, 3, 3, 3), f32),
        "conv1_b": 0.01 * jax.random.normal(ks[1], (8,), f32),
        "conv2_w": 0.10 * jax.random.normal(ks[2], (16, 8, 3, 3), f32),
        "conv2_b": 0.01 * jax.random.normal(ks[3], (16,), f32),
        "fc1_w": 0.05 * jax.random.normal(ks[4], (32, 256), f32),   # (out, in)
        "fc1_b": 0.01 * jax.random.normal(ks[5], (32,), f32),
        "fc2_w": 0.05 * jax.random.normal(ks[6], (10, 32), f32),
        "fc2_b": 0.01 * jax.random.normal(ks[7], (10,), f32),
    }


def prepare_params(src, tgt, cs):
    """One-time relayout of parameters into kernel-ready form (hoisted out of the hot path)."""
    f32 = jnp.float32

    def conv_w(w):
        oc = w.shape[0]
        wm = w.reshape(oc, -1)
        k = wm.shape[1]
        kp = -(-k // 8) * 8
        if kp != k:
            wm = jnp.pad(wm, ((0, 0), (0, kp - k)))
        return wm.astype(f32)                                   # (OC, Kp)

    def cs_feat(a):                                             # (C,2,2) -> (4, C, 1)
        c = a.shape[0]
        return jnp.stack([a[:, 0, 0], a[:, 0, 1], a[:, 1, 0], a[:, 1, 1]],
                         axis=0).reshape(4, c, 1).astype(f32)

    def cs_fc(a):                                               # (1,2,2) -> (4,) scalars
        return a.reshape(4).astype(f32)

    return {
        "conv1_w1": conv_w(src["conv1_w"]), "conv1_w2": conv_w(tgt["conv1_w"]),
        "conv1_b": jnp.stack([src["conv1_b"], tgt["conv1_b"]]).reshape(2, -1, 1).astype(f32),
        "conv2_w1": conv_w(src["conv2_w"]), "conv2_w2": conv_w(tgt["conv2_w"]),
        "conv2_b": jnp.stack([src["conv2_b"], tgt["conv2_b"]]).reshape(2, -1, 1).astype(f32),
        "fc1_w1": src["fc1_w"].T.astype(f32), "fc1_w2": tgt["fc1_w"].T.astype(f32),
        "fc1_b": jnp.stack([src["fc1_b"], tgt["fc1_b"]]).reshape(2, 1, -1).astype(f32),
        "fc2_w1": src["fc2_w"].T.astype(f32), "fc2_w2": tgt["fc2_w"].T.astype(f32),
        "fc2_b": jnp.stack([src["fc2_b"], tgt["fc2_b"]]).reshape(2, 1, -1).astype(f32),
        "cs0": cs_feat(cs[0]), "cs1": cs_feat(cs[1]),
        "cs2": cs_fc(cs[2]), "cs3": cs_fc(cs[3]),
    }


# ----------------------------------------------------------------------------
# CrossStitchNetwork forward (6 pallas_call launches total)
# ----------------------------------------------------------------------------
def cross_stitch_forward(x, p):
    n = x.shape[0]

    # ---- features, block 1: Conv+ReLU (both towers, 1 kernel), MaxPool, CS ----
    cols_t, oh, ow = _im2col_t(x)                            # both towers share input x
    f = pallas_dual_conv(cols_t, cols_t, p["conv1_w1"], p["conv1_w2"], p["conv1_b"])
    f = _maxpool2_cm(f, n, oh, ow)                           # (2, 8, n*8*8)
    f = pallas_cross_stitch(f, p["cs0"])

    # ---- features, block 2 ----
    c1, h1, w1 = f.shape[1], oh // 2, ow // 2
    x1_nchw = f[0].reshape(c1, n, h1, w1).transpose(1, 0, 2, 3)
    x2_nchw = f[1].reshape(c1, n, h1, w1).transpose(1, 0, 2, 3)
    c1t, oh2, ow2 = _im2col_t(x1_nchw)
    c2t, _, _ = _im2col_t(x2_nchw)
    f = pallas_dual_conv(c1t, c2t, p["conv2_w1"], p["conv2_w2"], p["conv2_b"])
    f = _maxpool2_cm(f, n, oh2, ow2)                         # (2, 16, n*4*4)
    f = pallas_cross_stitch(f, p["cs1"])

    # ---- flatten (NCHW contiguous, like PyTorch .view(N, -1)), stack towers ----
    c2, h2, w2 = f.shape[1], oh2 // 2, ow2 // 2
    x1f = f[0].reshape(c2, n, h2, w2).transpose(1, 0, 2, 3).reshape(n, -1)
    x2f = f[1].reshape(c2, n, h2, w2).transpose(1, 0, 2, 3).reshape(n, -1)
    xc = jnp.stack([x1f, x2f], axis=0)                       # (2, n, 256)

    # ---- classfier: Linear -> CS -> ReLU (fused), Linear -> CS (fused) ----
    xc = pallas_dual_fc_cs(xc, p["fc1_w1"], p["fc1_w2"], p["fc1_b"], p["cs2"], apply_relu=True)
    xc = pallas_dual_fc_cs(xc, p["fc2_w1"], p["fc2_w2"], p["fc2_b"], p["cs3"], apply_relu=False)
    return xc[0], xc[1]


if __name__ == "__main__":
    key = jax.random.PRNGKey(0)
    k_x, k_src, k_tgt = jax.random.split(key, 3)

    x = jax.random.normal(k_x, (2, 3, 16, 16), dtype=jnp.float32)

    src_params = init_tower_params(k_src)
    tgt_params = init_tower_params(k_tgt)
    cs_params = (
        _cross_stitch_params(8),    # after features MaxPool #1 (C=8)
        _cross_stitch_params(16),   # after features MaxPool #2 (C=16)
        _cross_stitch_params(1),    # after classfier Linear #1 (2D unit)
        _cross_stitch_params(1),    # after classfier Linear #2 (2D unit)
    )
    params = prepare_params(src_params, tgt_params, cs_params)

    fwd = jax.jit(cross_stitch_forward)
    out1, out2 = fwd(x, params)
    jax.block_until_ready((out1, out2))

    assert out1.shape == (2, 10) and out2.shape == (2, 10)
    assert jnp.all(jnp.isfinite(out1)) and jnp.all(jnp.isfinite(out2))
    print("KERNEL_OK")
</pallas_src>

<mosaic_0001>
module attributes {stable_mosaic.version = 11 : i64} {
  func.func @_dual_conv_kernel(%arg0: memref<32x512xf32, #tpu.memory_space<vmem>>, %arg1: memref<32x512xf32, #tpu.memory_space<vmem>>, %arg2: memref<8x32xf32, #tpu.memory_space<vmem>>, %arg3: memref<8x32xf32, #tpu.memory_space<vmem>>, %arg4: memref<2x8x1xf32, #tpu.memory_space<vmem>>, %arg5: memref<2x8x512xf32, #tpu.memory_space<vmem>>) attributes {dimension_semantics = [], scalar_prefetch = 0 : i64, scratch_operands = 0 : i64, tpu.core_type = #tpu.core_type<tc>} {
    %c0 = arith.constant 0 : index
    %c0_0 = arith.constant 0 : index
    %0 = vector.load %arg2[%c0, %c0_0] : memref<8x32xf32, #tpu.memory_space<vmem>>, vector<8x32xf32>
    %c0_1 = arith.constant 0 : index
    %c0_2 = arith.constant 0 : index
    %1 = vector.load %arg0[%c0_1, %c0_2] : memref<32x512xf32, #tpu.memory_space<vmem>>, vector<32x512xf32>
    %cst = arith.constant dense<0.000000e+00> : vector<8x512xf32>
    %2 = tpu.matmul %0, %1, %cst {dimension_numbers = #tpu.dot_dimension_numbers<[1], [0], [0], [1], [0, 0, 1, 1], [], []>} : vector<8x32xf32>, vector<32x512xf32>, vector<8x512xf32> -> vector<8x512xf32>
    %c0_3 = arith.constant 0 : index
    %c0_4 = arith.constant 0 : index
    %3 = vector.load %arg3[%c0_3, %c0_4] : memref<8x32xf32, #tpu.memory_space<vmem>>, vector<8x32xf32>
    %c0_5 = arith.constant 0 : index
    %c0_6 = arith.constant 0 : index
    %4 = vector.load %arg1[%c0_5, %c0_6] : memref<32x512xf32, #tpu.memory_space<vmem>>, vector<32x512xf32>
    %cst_7 = arith.constant dense<0.000000e+00> : vector<8x512xf32>
    %5 = tpu.matmul %3, %4, %cst_7 {dimension_numbers = #tpu.dot_dimension_numbers<[1], [0], [0], [1], [0, 0, 1, 1], [], []>} : vector<8x32xf32>, vector<32x512xf32>, vector<8x512xf32> -> vector<8x512xf32>
    %c0_8 = arith.constant 0 : index
    %c0_9 = arith.constant 0 : index
    %c0_10 = arith.constant 0 : index
    %6 = vector.load %arg4[%c0_8, %c0_9, %c0_10] : memref<2x8x1xf32, #tpu.memory_space<vmem>>, vector<1x8x1xf32>
    %7 = vector.shape_cast %6 : vector<1x8x1xf32> to vector<8x1xf32>
    %8 = vector.broadcast %7 : vector<8x1xf32> to vector<8x512xf32>
    %9 = arith.addf %2, %8 : vector<8x512xf32>
    %cst_11 = arith.constant 0.000000e+00 : f32
    %10 = vector.broadcast %cst_11 : f32 to vector<8x512xf32>
    %11 = arith.maximumf %9, %10 : vector<8x512xf32>
    %c0_12 = arith.constant 0 : index
    %c0_13 = arith.constant 0 : index
    %c0_14 = arith.constant 0 : index
    %12 = vector.load %arg5[%c0_12, %c0_13, %c0_14] : memref<2x8x512xf32, #tpu.memory_space<vmem>>, vector<1x8x512xf32>
    %13 = vector.shape_cast %12 : vector<1x8x512xf32> to vector<8x512xf32>
    %14 = vector.shape_cast %11 : vector<8x512xf32> to vector<1x8x512xf32>
    tpu.vector_store %arg5[%c0_12, %c0_13, %c0_14], %14 {strides = array<i32>} : memref<2x8x512xf32, #tpu.memory_space<vmem>>, vector<1x8x512xf32>,
    %c1 = arith.constant 1 : index
    %c0_15 = arith.constant 0 : index
    %c0_16 = arith.constant 0 : index
    %15 = vector.load %arg4[%c1, %c0_15, %c0_16] : memref<2x8x1xf32, #tpu.memory_space<vmem>>, vector<1x8x1xf32>
    %16 = vector.shape_cast %15 : vector<1x8x1xf32> to vector<8x1xf32>
    %17 = vector.broadcast %16 : vector<8x1xf32> to vector<8x512xf32>
    %18 = arith.addf %5, %17 : vector<8x512xf32>
    %cst_17 = arith.constant 0.000000e+00 : f32
    %19 = vector.broadcast %cst_17 : f32 to vector<8x512xf32>
    %20 = arith.maximumf %18, %19 : vector<8x512xf32>
    %c1_18 = arith.constant 1 : index
    %c0_19 = arith.constant 0 : index
    %c0_20 = arith.constant 0 : index
    %21 = vector.load %arg5[%c1_18, %c0_19, %c0_20] : memref<2x8x512xf32, #tpu.memory_space<vmem>>, vector<1x8x512xf32>
    %22 = vector.shape_cast %21 : vector<1x8x512xf32> to vector<8x512xf32>
    %23 = vector.shape_cast %20 : vector<8x512xf32> to vector<1x8x512xf32>
    tpu.vector_store %arg5[%c1_18, %c0_19, %c0_20], %23 {strides = array<i32>} : memref<2x8x512xf32, #tpu.memory_space<vmem>>, vector<1x8x512xf32>,
    return
  }
}

module attributes {stable_mosaic.version = 11 : i64} {
  func.func @_cross_stitch_kernel(%arg0: memref<2x8x128xf32, #tpu.memory_space<vmem>>, %arg1: memref<4x8x1xf32, #tpu.memory_space<vmem>>, %arg2: memref<2x8x128xf32, #tpu.memory_space<vmem>>) attributes {dimension_semantics = [], scalar_prefetch = 0 : i64, scratch_operands = 0 : i64, tpu.core_type = #tpu.core_type<tc>} {
    %c0 = arith.constant 0 : index
    %c0_0 = arith.constant 0 : index
    %c0_1 = arith.constant 0 : index
    %0 = vector.load %arg0[%c0, %c0_0, %c0_1] : memref<2x8x128xf32, #tpu.memory_space<vmem>>, vector<1x8x128xf32>
    %1 = vector.shape_cast %0 : vector<1x8x128xf32> to vector<8x128xf32>
    %c1 = arith.constant 1 : index
    %c0_2 = arith.constant 0 : index
    %c0_3 = arith.constant 0 : index
    %2 = vector.load %arg0[%c1, %c0_2, %c0_3] : memref<2x8x128xf32, #tpu.memory_space<vmem>>, vector<1x8x128xf32>
    %3 = vector.shape_cast %2 : vector<1x8x128xf32> to vector<8x128xf32>
    %c0_4 = arith.constant 0 : index
    %c0_5 = arith.constant 0 : index
    %c0_6 = arith.constant 0 : index
    %4 = vector.load %arg1[%c0_4, %c0_5, %c0_6] : memref<4x8x1xf32, #tpu.memory_space<vmem>>, vector<1x8x1xf32>
    %5 = vector.shape_cast %4 : vector<1x8x1xf32> to vector<8x1xf32>
    %6 = vector.broadcast %5 : vector<8x1xf32> to vector<8x128xf32>
    %7 = arith.mulf %6, %1 : vector<8x128xf32>
    %c1_7 = arith.constant 1 : index
    %c0_8 = arith.constant 0 : index
    %c0_9 = arith.constant 0 : index
    %8 = vector.load %arg1[%c1_7, %c0_8, %c0_9] : memref<4x8x1xf32, #tpu.memory_space<vmem>>, vector<1x8x1xf32>
    %9 = vector.shape_cast %8 : vector<1x8x1xf32> to vector<8x1xf32>
    %10 = vector.broadcast %9 : vector<8x1xf32> to vector<8x128xf32>
    %11 = arith.mulf %10, %3 : vector<8x128xf32>
    %12 = arith.addf %7, %11 : vector<8x128xf32>
    %c0_10 = arith.constant 0 : index
    %c0_11 = arith.constant 0 : index
    %c0_12 = arith.constant 0 : index
    %13 = vector.load %arg2[%c0_10, %c0_11, %c0_12] : memref<2x8x128xf32, #tpu.memory_space<vmem>>, vector<1x8x128xf32>
    %14 = vector.shape_cast %13 : vector<1x8x128xf32> to vector<8x128xf32>
    %15 = vector.shape_cast %12 : vector<8x128xf32> to vector<1x8x128xf32>
    tpu.vector_store %arg2[%c0_10, %c0_11, %c0_12], %15 {strides = array<i32>} : memref<2x8x128xf32, #tpu.memory_space<vmem>>, vector<1x8x128xf32>,
    %c2 = arith.constant 2 : index
    %c0_13 = arith.constant 0 : index
    %c0_14 = arith.constant 0 : index
    %16 = vector.load %arg1[%c2, %c0_13, %c0_14] : memref<4x8x1xf32, #tpu.memory_space<vmem>>, vector<1x8x1xf32>
    %17 = vector.shape_cast %16 : vector<1x8x1xf32> to vector<8x1xf32>
    %18 = vector.broadcast %17 : vector<8x1xf32> to vector<8x128xf32>
    %19 = arith.mulf %18, %1 : vector<8x128xf32>
    %c3 = arith.constant 3 : index
    %c0_15 = arith.constant 0 : index
    %c0_16 = arith.constant 0 : index
    %20 = vector.load %arg1[%c3, %c0_15, %c0_16] : memref<4x8x1xf32, #tpu.memory_space<vmem>>, vector<1x8x1xf32>
    %21 = vector.shape_cast %20 : vector<1x8x1xf32> to vector<8x1xf32>
    %22 = vector.broadcast %21 : vector<8x1xf32> to vector<8x128xf32>
    %23 = arith.mulf %22, %3 : vector<8x128xf32>
    %24 = arith.addf %19, %23 : vector<8x128xf32>
    %c1_17 = arith.constant 1 : index
    %c0_18 = arith.constant 0 : index
    %c0_19 = arith.constant 0 : index
    %25 = vector.load %arg2[%c1_17, %c0_18, %c0_19] : memref<2x8x128xf32, #tpu.memory_space<vmem>>, vector<1x8x128xf32>
    %26 = vector.shape_cast %25 : vector<1x8x128xf32> to vector<8x128xf32>
    %27 = vector.shape_cast %24 : vector<8x128xf32> to vector<1x8x128xf32>
    tpu.vector_store %arg2[%c1_17, %c0_18, %c0_19], %27 {strides = array<i32>} : memref<2x8x128xf32, #tpu.memory_space<vmem>>, vector<1x8x128xf32>,
    return
  }
}

module attributes {stable_mosaic.version = 11 : i64} {
  func.func @_dual_conv_kernel(%arg0: memref<72x128xf32, #tpu.memory_space<vmem>>, %arg1: memref<72x128xf32, #tpu.memory_space<vmem>>, %arg2: memref<16x72xf32, #tpu.memory_space<vmem>>, %arg3: memref<16x72xf32, #tpu.memory_space<vmem>>, %arg4: memref<2x16x1xf32, #tpu.memory_space<vmem>>, %arg5: memref<2x16x128xf32, #tpu.memory_space<vmem>>) attributes {dimension_semantics = [], scalar_prefetch = 0 : i64, scratch_operands = 0 : i64, tpu.core_type = #tpu.core_type<tc>} {
    %c0 = arith.constant 0 : index
    %c0_0 = arith.constant 0 : index
    %0 = vector.load %arg2[%c0, %c0_0] : memref<16x72xf32, #tpu.memory_space<vmem>>, vector<16x72xf32>
    %c0_1 = arith.constant 0 : index
    %c0_2 = arith.constant 0 : index
    %1 = vector.load %arg0[%c0_1, %c0_2] : memref<72x128xf32, #tpu.memory_space<vmem>>, vector<72x128xf32>
    %cst = arith.constant dense<0.000000e+00> : vector<16x128xf32>
    %2 = tpu.matmul %0, %1, %cst {dimension_numbers = #tpu.dot_dimension_numbers<[1], [0], [0], [1], [0, 0, 1, 1], [], []>} : vector<16x72xf32>, vector<72x128xf32>, vector<16x128xf32> -> vector<16x128xf32>
    %c0_3 = arith.constant 0 : index
    %c0_4 = arith.constant 0 : index
    %3 = vector.load %arg3[%c0_3, %c0_4] : memref<16x72xf32, #tpu.memory_space<vmem>>, vector<16x72xf32>
    %c0_5 = arith.constant 0 : index
    %c0_6 = arith.constant 0 : index
    %4 = vector.load %arg1[%c0_5, %c0_6] : memref<72x128xf32, #tpu.memory_space<vmem>>, vector<72x128xf32>
    %cst_7 = arith.constant dense<0.000000e+00> : vector<16x128xf32>
    %5 = tpu.matmul %3, %4, %cst_7 {dimension_numbers = #tpu.dot_dimension_numbers<[1], [0], [0], [1], [0, 0, 1, 1], [], []>} : vector<16x72xf32>, vector<72x128xf32>, vector<16x128xf32> -> vector<16x128xf32>
    %c0_8 = arith.constant 0 : index
    %c0_9 = arith.constant 0 : index
    %c0_10 = arith.constant 0 : index
    %6 = vector.load %arg4[%c0_8, %c0_9, %c0_10] : memref<2x16x1xf32, #tpu.memory_space<vmem>>, vector<1x16x1xf32>
    %7 = vector.shape_cast %6 : vector<1x16x1xf32> to vector<16x1xf32>
    %8 = vector.broadcast %7 : vector<16x1xf32> to vector<16x128xf32>
    %9 = arith.addf %2, %8 : vector<16x128xf32>
    %cst_11 = arith.constant 0.000000e+00 : f32
    %10 = vector.broadcast %cst_11 : f32 to vector<16x128xf32>
    %11 = arith.maximumf %9, %10 : vector<16x128xf32>
    %c0_12 = arith.constant 0 : index
    %c0_13 = arith.constant 0 : index
    %c0_14 = arith.constant 0 : index
    %12 = vector.load %arg5[%c0_12, %c0_13, %c0_14] : memref<2x16x128xf32, #tpu.memory_space<vmem>>, vector<1x16x128xf32>
    %13 = vector.shape_cast %12 : vector<1x16x128xf32> to vector<16x128xf32>
    %14 = vector.shape_cast %11 : vector<16x128xf32> to vector<1x16x128xf32>
    tpu.vector_store %arg5[%c0_12, %c0_13, %c0_14], %14 {strides = array<i32>} : memref<2x16x128xf32, #tpu.memory_space<vmem>>, vector<1x16x128xf32>,
    %c1 = arith.constant 1 : index
    %c0_15 = arith.constant 0 : index
    %c0_16 = arith.constant 0 : index
    %15 = vector.load %arg4[%c1, %c0_15, %c0_16] : memref<2x16x1xf32, #tpu.memory_space<vmem>>, vector<1x16x1xf32>
    %16 = vector.shape_cast %15 : vector<1x16x1xf32> to vector<16x1xf32>
    %17 = vector.broadcast %16 : vector<16x1xf32> to vector<16x128xf32>
    %18 = arith.addf %5, %17 : vector<16x128xf32>
    %cst_17 = arith.constant 0.000000e+00 : f32
    %19 = vector.broadcast %cst_17 : f32 to vector<16x128xf32>
    %20 = arith.maximumf %18, %19 : vector<16x128xf32>
    %c1_18 = arith.constant 1 : index
    %c0_19 = arith.constant 0 : index
    %c0_20 = arith.constant 0 : index
    %21 = vector.load %arg5[%c1_18, %c0_19, %c0_20] : memref<2x16x128xf32, #tpu.memory_space<vmem>>, vector<1x16x128xf32>
    %22 = vector.shape_cast %21 : vector<1x16x128xf32> to vector<16x128xf32>
    %23 = vector.shape_cast %20 : vector<16x128xf32> to vector<1x16x128xf32>
    tpu.vector_store %arg5[%c1_18, %c0_19, %c0_20], %23 {strides = array<i32>} : memref<2x16x128xf32, #tpu.memory_space<vmem>>, vector<1x16x128xf32>,
    return
  }
}

module attributes {stable_mosaic.version = 11 : i64} {
  func.func @_cross_stitch_kernel(%arg0: memref<2x16x32xf32, #tpu.memory_space<vmem>>, %arg1: memref<4x16x1xf32, #tpu.memory_space<vmem>>, %arg2: memref<2x16x32xf32, #tpu.memory_space<vmem>>) attributes {dimension_semantics = [], scalar_prefetch = 0 : i64, scratch_operands = 0 : i64, tpu.core_type = #tpu.core_type<tc>} {
    %c0 = arith.constant 0 : index
    %c0_0 = arith.constant 0 : index
    %c0_1 = arith.constant 0 : index
    %0 = vector.load %arg0[%c0, %c0_0, %c0_1] : memref<2x16x32xf32, #tpu.memory_space<vmem>>, vector<1x16x32xf32>
    %1 = vector.shape_cast %0 : vector<1x16x32xf32> to vector<16x32xf32>
    %c1 = arith.constant 1 : index
    %c0_2 = arith.constant 0 : index
    %c0_3 = arith.constant 0 : index
    %2 = vector.load %arg0[%c1, %c0_2, %c0_3] : memref<2x16x32xf32, #tpu.memory_space<vmem>>, vector<1x16x32xf32>
    %3 = vector.shape_cast %2 : vector<1x16x32xf32> to vector<16x32xf32>
    %c0_4 = arith.constant 0 : index
    %c0_5 = arith.constant 0 : index
    %c0_6 = arith.constant 0 : index
    %4 = vector.load %arg1[%c0_4, %c0_5, %c0_6] : memref<4x16x1xf32, #tpu.memory_space<vmem>>, vector<1x16x1xf32>
    %5 = vector.shape_cast %4 : vector<1x16x1xf32> to vector<16x1xf32>
    %6 = vector.broadcast %5 : vector<16x1xf32> to vector<16x32xf32>
    %7 = arith.mulf %6, %1 : vector<16x32xf32>
    %c1_7 = arith.constant 1 : index
    %c0_8 = arith.constant 0 : index
    %c0_9 = arith.constant 0 : index
    %8 = vector.load %arg1[%c1_7, %c0_8, %c0_9] : memref<4x16x1xf32, #tpu.memory_space<vmem>>, vector<1x16x1xf32>
    %9 = vector.shape_cast %8 : vector<1x16x1xf32> to vector<16x1xf32>
    %10 = vector.broadcast %9 : vector<16x1xf32> to vector<16x32xf32>
    %11 = arith.mulf %10, %3 : vector<16x32xf32>
    %12 = arith.addf %7, %11 : vector<16x32xf32>
    %c0_10 = arith.constant 0 : index
    %c0_11 = arith.constant 0 : index
    %c0_12 = arith.constant 0 : index
    %13 = vector.load %arg2[%c0_10, %c0_11, %c0_12] : memref<2x16x32xf32, #tpu.memory_space<vmem>>, vector<1x16x32xf32>
    %14 = vector.shape_cast %13 : vector<1x16x32xf32> to vector<16x32xf32>
    %15 = vector.shape_cast %12 : vector<16x32xf32> to vector<1x16x32xf32>
    tpu.vector_store %arg2[%c0_10, %c0_11, %c0_12], %15 {strides = array<i32>} : memref<2x16x32xf32, #tpu.memory_space<vmem>>, vector<1x16x32xf32>,
    %c2 = arith.constant 2 : index
    %c0_13 = arith.constant 0 : index
    %c0_14 = arith.constant 0 : index
    %16 = vector.load %arg1[%c2, %c0_13, %c0_14] : memref<4x16x1xf32, #tpu.memory_space<vmem>>, vector<1x16x1xf32>
    %17 = vector.shape_cast %16 : vector<1x16x1xf32> to vector<16x1xf32>
    %18 = vector.broadcast %17 : vector<16x1xf32> to vector<16x32xf32>
    %19 = arith.mulf %18, %1 : vector<16x32xf32>
    %c3 = arith.constant 3 : index
    %c0_15 = arith.constant 0 : index
    %c0_16 = arith.constant 0 : index
    %20 = vector.load %arg1[%c3, %c0_15, %c0_16] : memref<4x16x1xf32, #tpu.memory_space<vmem>>, vector<1x16x1xf32>
    %21 = vector.shape_cast %20 : vector<1x16x1xf32> to vector<16x1xf32>
    %22 = vector.broadcast %21 : vector<16x1xf32> to vector<16x32xf32>
    %23 = arith.mulf %22, %3 : vector<16x32xf32>
    %24 = arith.addf %19, %23 : vector<16x32xf32>
    %c1_17 = arith.constant 1 : index
    %c0_18 = arith.constant 0 : index
    %c0_19 = arith.constant 0 : index
    %25 = vector.load %arg2[%c1_17, %c0_18, %c0_19] : memref<2x16x32xf32, #tpu.memory_space<vmem>>, vector<1x16x32xf32>
    %26 = vector.shape_cast %25 : vector<1x16x32xf32> to vector<16x32xf32>
    %27 = vector.shape_cast %24 : vector<16x32xf32> to vector<1x16x32xf32>
    tpu.vector_store %arg2[%c1_17, %c0_18, %c0_19], %27 {strides = array<i32>} : memref<2x16x32xf32, #tpu.memory_space<vmem>>, vector<1x16x32xf32>,
    return
  }
}

module attributes {stable_mosaic.version = 11 : i64} {
  func.func @_dual_fc_cs_kernel(%arg0: memref<2x2x32xf32, #tpu.memory_space<vmem>>, %arg1: memref<32x10xf32, #tpu.memory_space<vmem>>, %arg2: memref<32x10xf32, #tpu.memory_space<vmem>>, %arg3: memref<2x1x10xf32, #tpu.memory_space<vmem>>, %arg4: memref<4xf32, #tpu.memory_space<smem>>, %arg5: memref<2x2x10xf32, #tpu.memory_space<vmem>>) attributes {dimension_semantics = [], scalar_prefetch = 0 : i64, scratch_operands = 0 : i64, tpu.core_type = #tpu.core_type<tc>} {
    %c0 = arith.constant 0 : index
    %c0_0 = arith.constant 0 : index
    %c0_1 = arith.constant 0 : index
    %0 = vector.load %arg0[%c0, %c0_0, %c0_1] : memref<2x2x32xf32, #tpu.memory_space<vmem>>, vector<1x2x32xf32>
    %1 = vector.shape_cast %0 : vector<1x2x32xf32> to vector<2x32xf32>
    %c0_2 = arith.constant 0 : index
    %c0_3 = arith.constant 0 : index
    %2 = vector.load %arg1[%c0_2, %c0_3] : memref<32x10xf32, #tpu.memory_space<vmem>>, vector<32x10xf32>
    %cst = arith.constant dense<0.000000e+00> : vector<2x10xf32>
    %3 = tpu.matmul %1, %2, %cst {dimension_numbers = #tpu.dot_dimension_numbers<[1], [0], [0], [1], [0, 0, 1, 1], [], []>} : vector<2x32xf32>, vector<32x10xf32>, vector<2x10xf32> -> vector<2x10xf32>
    %c0_4 = arith.constant 0 : index
    %c0_5 = arith.constant 0 : index
    %c0_6 = arith.constant 0 : index
    %4 = vector.load %arg3[%c0_4, %c0_5, %c0_6] : memref<2x1x10xf32, #tpu.memory_space<vmem>>, vector<1x1x10xf32>
    %5 = vector.shape_cast %4 : vector<1x1x10xf32> to vector<1x10xf32>
    %6 = vector.broadcast %5 : vector<1x10xf32> to vector<2x10xf32>
    %7 = arith.addf %3, %6 : vector<2x10xf32>
    %c1 = arith.constant 1 : index
    %c0_7 = arith.constant 0 : index
    %c0_8 = arith.constant 0 : index
    %8 = vector.load %arg0[%c1, %c0_7, %c0_8] : memref<2x2x32xf32, #tpu.memory_space<vmem>>, vector<1x2x32xf32>
    %9 = vector.shape_cast %8 : vector<1x2x32xf32> to vector<2x32xf32>
    %c0_9 = arith.constant 0 : index
    %c0_10 = arith.constant 0 : index
    %10 = vector.load %arg2[%c0_9, %c0_10] : memref<32x10xf32, #tpu.memory_space<vmem>>, vector<32x10xf32>
    %cst_11 = arith.constant dense<0.000000e+00> : vector<2x10xf32>
    %11 = tpu.matmul %9, %10, %cst_11 {dimension_numbers = #tpu.dot_dimension_numbers<[1], [0], [0], [1], [0, 0, 1, 1], [], []>} : vector<2x32xf32>, vector<32x10xf32>, vector<2x10xf32> -> vector<2x10xf32>
    %c1_12 = arith.constant 1 : index
    %c0_13 = arith.constant 0 : index
    %c0_14 = arith.constant 0 : index
    %12 = vector.load %arg3[%c1_12, %c0_13, %c0_14] : memref<2x1x10xf32, #tpu.memory_space<vmem>>, vector<1x1x10xf32>
    %13 = vector.shape_cast %12 : vector<1x1x10xf32> to vector<1x10xf32>
    %14 = vector.broadcast %13 : vector<1x10xf32> to vector<2x10xf32>
    %15 = arith.addf %11, %14 : vector<2x10xf32>
    %c0_15 = arith.constant 0 : index
    %16 = memref.load %arg4[%c0_15] : memref<4xf32, #tpu.memory_space<smem>>
    %17 = vector.broadcast %16 : f32 to vector<2x10xf32>
    %18 = arith.mulf %17, %7 : vector<2x10xf32>
    %c1_16 = arith.constant 1 : index
    %19 = memref.load %arg4[%c1_16] : memref<4xf32, #tpu.memory_space<smem>>
    %20 = vector.broadcast %19 : f32 to vector<2x10xf32>
    %21 = arith.mulf %20, %15 : vector<2x10xf32>
    %22 = arith.addf %18, %21 : vector<2x10xf32>
    %c2 = arith.constant 2 : index
    %23 = memref.load %arg4[%c2] : memref<4xf32, #tpu.memory_space<smem>>
    %24 = vector.broadcast %23 : f32 to vector<2x10xf32>
    %25 = arith.mulf %24, %7 : vector<2x10xf32>
    %c3 = arith.constant 3 : index
    %26 = memref.load %arg4[%c3] : memref<4xf32, #tpu.memory_space<smem>>
    %27 = vector.broadcast %26 : f32 to vector<2x10xf32>
    %28 = arith.mulf %27, %15 : vector<2x10xf32>
    %29 = arith.addf %25, %28 : vector<2x10xf32>
    %c0_17 = arith.constant 0 : index
    %c0_18 = arith.constant 0 : index
    %c0_19 = arith.constant 0 : index
    %30 = vector.load %arg5[%c0_17, %c0_18, %c0_19] : memref<2x2x10xf32, #tpu.memory_space<vmem>>, vector<1x2x10xf32>
    %31 = vector.shape_cast %30 : vector<1x2x10xf32> to vector<2x10xf32>
    %32 = vector.shape_cast %22 : vector<2x10xf32> to vector<1x2x10xf32>
    tpu.vector_store %arg5[%c0_17, %c0_18, %c0_19], %32 {strides = array<i32>} : memref<2x2x10xf32, #tpu.memory_space<vmem>>, vector<1x2x10xf32>,
    %c1_20 = arith.constant 1 : index
    %c0_21 = arith.constant 0 : index
    %c0_22 = arith.constant 0 : index
    %33 = vector.load %arg5[%c1_20, %c0_21, %c0_22] : memref<2x2x10xf32, #tpu.memory_space<vmem>>, vector<1x2x10xf32>
    %34 = vector.shape_cast %33 : vector<1x2x10xf32> to vector<2x10xf32>
    %35 = vector.shape_cast %29 : vector<2x10xf32> to vector<1x2x10xf32>
    tpu.vector_store %arg5[%c1_20, %c0_21, %c0_22], %35 {strides = array<i32>} : memref<2x2x10xf32, #tpu.memory_space<vmem>>, vector<1x2x10xf32>,
    return
  }
}

module attributes {stable_mosaic.version = 11 : i64} {
  func.func @_dual_fc_cs_kernel(%arg0: memref<2x2x256xf32, #tpu.memory_space<vmem>>, %arg1: memref<256x32xf32, #tpu.memory_space<vmem>>, %arg2: memref<256x32xf32, #tpu.memory_space<vmem>>, %arg3: memref<2x1x32xf32, #tpu.memory_space<vmem>>, %arg4: memref<4xf32, #tpu.memory_space<smem>>, %arg5: memref<2x2x32xf32, #tpu.memory_space<vmem>>) attributes {dimension_semantics = [], scalar_prefetch = 0 : i64, scratch_operands = 0 : i64, tpu.core_type = #tpu.core_type<tc>} {
    %c0 = arith.constant 0 : index
    %c0_0 = arith.constant 0 : index
    %c0_1 = arith.constant 0 : index
    %0 = vector.load %arg0[%c0, %c0_0, %c0_1] : memref<2x2x256xf32, #tpu.memory_space<vmem>>, vector<1x2x256xf32>
    %1 = vector.shape_cast %0 : vector<1x2x256xf32> to vector<2x256xf32>
    %c0_2 = arith.constant 0 : index
    %c0_3 = arith.constant 0 : index
    %2 = vector.load %arg1[%c0_2, %c0_3] : memref<256x32xf32, #tpu.memory_space<vmem>>, vector<256x32xf32>
    %cst = arith.constant dense<0.000000e+00> : vector<2x32xf32>
    %3 = tpu.matmul %1, %2, %cst {dimension_numbers = #tpu.dot_dimension_numbers<[1], [0], [0], [1], [0, 0, 1, 1], [], []>} : vector<2x256xf32>, vector<256x32xf32>, vector<2x32xf32> -> vector<2x32xf32>
    %c0_4 = arith.constant 0 : index
    %c0_5 = arith.constant 0 : index
    %c0_6 = arith.constant 0 : index
    %4 = vector.load %arg3[%c0_4, %c0_5, %c0_6] : memref<2x1x32xf32, #tpu.memory_space<vmem>>, vector<1x1x32xf32>
    %5 = vector.shape_cast %4 : vector<1x1x32xf32> to vector<1x32xf32>
    %6 = vector.broadcast %5 : vector<1x32xf32> to vector<2x32xf32>
    %7 = arith.addf %3, %6 : vector<2x32xf32>
    %c1 = arith.constant 1 : index
    %c0_7 = arith.constant 0 : index
    %c0_8 = arith.constant 0 : index
    %8 = vector.load %arg0[%c1, %c0_7, %c0_8] : memref<2x2x256xf32, #tpu.memory_space<vmem>>, vector<1x2x256xf32>
    %9 = vector.shape_cast %8 : vector<1x2x256xf32> to vector<2x256xf32>
    %c0_9 = arith.constant 0 : index
    %c0_10 = arith.constant 0 : index
    %10 = vector.load %arg2[%c0_9, %c0_10] : memref<256x32xf32, #tpu.memory_space<vmem>>, vector<256x32xf32>
    %cst_11 = arith.constant dense<0.000000e+00> : vector<2x32xf32>
    %11 = tpu.matmul %9, %10, %cst_11 {dimension_numbers = #tpu.dot_dimension_numbers<[1], [0], [0], [1], [0, 0, 1, 1], [], []>} : vector<2x256xf32>, vector<256x32xf32>, vector<2x32xf32> -> vector<2x32xf32>
    %c1_12 = arith.constant 1 : index
    %c0_13 = arith.constant 0 : index
    %c0_14 = arith.constant 0 : index
    %12 = vector.load %arg3[%c1_12, %c0_13, %c0_14] : memref<2x1x32xf32, #tpu.memory_space<vmem>>, vector<1x1x32xf32>
    %13 = vector.shape_cast %12 : vector<1x1x32xf32> to vector<1x32xf32>
    %14 = vector.broadcast %13 : vector<1x32xf32> to vector<2x32xf32>
    %15 = arith.addf %11, %14 : vector<2x32xf32>
    %c0_15 = arith.constant 0 : index
    %16 = memref.load %arg4[%c0_15] : memref<4xf32, #tpu.memory_space<smem>>
    %17 = vector.broadcast %16 : f32 to vector<2x32xf32>
    %18 = arith.mulf %17, %7 : vector<2x32xf32>
    %c1_16 = arith.constant 1 : index
    %19 = memref.load %arg4[%c1_16] : memref<4xf32, #tpu.memory_space<smem>>
    %20 = vector.broadcast %19 : f32 to vector<2x32xf32>
    %21 = arith.mulf %20, %15 : vector<2x32xf32>
    %22 = arith.addf %18, %21 : vector<2x32xf32>
    %c2 = arith.constant 2 : index
    %23 = memref.load %arg4[%c2] : memref<4xf32, #tpu.memory_space<smem>>
    %24 = vector.broadcast %23 : f32 to vector<2x32xf32>
    %25 = arith.mulf %24, %7 : vector<2x32xf32>
    %c3 = arith.constant 3 : index
    %26 = memref.load %arg4[%c3] : memref<4xf32, #tpu.memory_space<smem>>
    %27 = vector.broadcast %26 : f32 to vector<2x32xf32>
    %28 = arith.mulf %27, %15 : vector<2x32xf32>
    %29 = arith.addf %25, %28 : vector<2x32xf32>
    %cst_17 = arith.constant 0.000000e+00 : f32
    %30 = vector.broadcast %cst_17 : f32 to vector<2x32xf32>
    %31 = arith.maximumf %22, %30 : vector<2x32xf32>
    %cst_18 = arith.constant 0.000000e+00 : f32
    %32 = vector.broadcast %cst_18 : f32 to vector<2x32xf32>
    %33 = arith.maximumf %29, %32 : vector<2x32xf32>
    %c0_19 = arith.constant 0 : index
    %c0_20 = arith.constant 0 : index
    %c0_21 = arith.constant 0 : index
    %34 = vector.load %arg5[%c0_19, %c0_20, %c0_21] : memref<2x2x32xf32, #tpu.memory_space<vmem>>, vector<1x2x32xf32>
    %35 = vector.shape_cast %34 : vector<1x2x32xf32> to vector<2x32xf32>
    %36 = vector.shape_cast %31 : vector<2x32xf32> to vector<1x2x32xf32>
    tpu.vector_store %arg5[%c0_19, %c0_20, %c0_21], %36 {strides = array<i32>} : memref<2x2x32xf32, #tpu.memory_space<vmem>>, vector<1x2x32xf32>,
    %c1_22 = arith.constant 1 : index
    %c0_23 = arith.constant 0 : index
    %c0_24 = arith.constant 0 : index
    %37 = vector.load %arg5[%c1_22, %c0_23, %c0_24] : memref<2x2x32xf32, #tpu.memory_space<vmem>>, vector<1x2x32xf32>
    %38 = vector.shape_cast %37 : vector<1x2x32xf32> to vector<2x32xf32>
    %39 = vector.shape_cast %33 : vector<2x32xf32> to vector<1x2x32xf32>
    tpu.vector_store %arg5[%c1_22, %c0_23, %c0_24], %39 {strides = array<i32>} : memref<2x2x32xf32, #tpu.memory_space<vmem>>, vector<1x2x32xf32>,
    return
  }
}

</mosaic_0001>

<bundles_post_ra>
// kernel: cross_stitch_forward.6
= control target key start
LH: loop header
LB: loop body
LE: loop exit
PB: predicated region body
PF: predicated region fallthrough
CT: control target
= control target key end

     0   :  { %v423_v3 = vmov 0.0   ;;  %v424_v8 = vmov 0   ;;  %vm60_vm0 = vcmask 261120   ;;  %s595_s0 = inlined_call_operand.vmem [shape: f32[32,512], index: 0, kind: input, shape index: {}, may-alias: {0,1}]   ;;  %s596_s1 = inlined_call_operand.vmem [shape: f32[32,512], index: 1, kind: input, shape index: {}, may-alias: {0,1}]   ;;  %s597_s2 = inlined_call_operand.vmem [shape: f32[8,32], index: 2, kind: input, shape index: {}]   ;;  %s598_s4 = inlined_call_operand.vmem [shape: f32[2,8,1], index: 4, kind: input, shape index: {}]   ;;  %s599_s3 = inlined_call_operand.vmem [shape: f32[8,32], index: 3, kind: input, shape index: {}]   ;;  %s600_s5 = inlined_call_operand.vmem [shape: f32[2,8,512], index: 5, kind: output, shape index: {}]  }
   0x1   :  { %v22_v0 = vld [vmem:[%s595_s0 + $0x8] sm:$0xff]  ;;  %v24_v2 = vld [vmem:[%s595_s0 + $0x18] sm:$0xff]  ;;  %128 = vmatprep.mubr.f32.mxu0 %v423_v3  ;;  %199 = vmatprep.mubr.f32.mxu1 %v423_v3  ;;  %v21_v6 = vld [vmem:[%s595_s0] sm:$0xff] }
   0x2   :  { %v26_v1 = vld [vmem:[%s595_s0 + $0x28] sm:$0xff]  ;;  %v28_v5 = vld [vmem:[%s595_s0 + $0x38] sm:$0xff]  ;;  %v25_v7 = vld [vmem:[%s595_s0 + $0x20] sm:$0xff]  ;;  %422 = vset.pattern.permute.xlu0 %v424_v8 }
   0x3   :  { %v388_v4 = vpack.c.bf16 %v26_v1, %v22_v0  ;;  %v396_v9 = vpack.c.bf16 %v28_v5, %v24_v2  ;;  %v390_v10 = vpack.c.bf16 %v25_v7, %v21_v6  ;;  %v23_v11 = vld [vmem:[%s595_s0 + $0x10] sm:$0xff]  ;;  %v30_v13 = vld [vmem:[%s595_s0 + $0x48] sm:$0xff]  ;;  %v32_v16 = vld [vmem:[%s595_s0 + $0x58] sm:$0xff] }
   0x4   :  { %v27_v12 = vld [vmem:[%s595_s0 + $0x30] sm:$0xff]  ;;  %v34_v15 = vld [vmem:[%s595_s0 + $0x68] sm:$0xff]  ;;  %v36_v17 = vld [vmem:[%s595_s0 + $0x78] sm:$0xff] }
   0x5   :  { %389 = vmatprep.subr.bf16.mxu0 %v388_v4  ;;  %v398_v14 = vpack.c.bf16 %v27_v12, %v23_v11  ;;  %397 = vmatprep.subr.bf16.mxu1 %v396_v9  ;;  %v392_v18 = vpack.c.bf16 %v34_v15, %v30_v13  ;;  %v400_v19 = vpack.c.bf16 %v36_v17, %v32_v16  ;;  %v29_v20 = vld [vmem:[%s595_s0 + $0x40] sm:$0xff]  ;;  %v31_v22 = vld [vmem:[%s595_s0 + $0x50] sm:$0xff]  ;;  %v39_v25 = vld [vmem:[%s596_s1 + $0x8] sm:$0xff] }
   0x6   :  { %391 = vmatpush1.bf16.msra.mxu0 %v390_v10  ;;  %v33_v21 = vld [vmem:[%s595_s0 + $0x60] sm:$0xff]  ;;  %v35_v24 = vld [vmem:[%s595_s0 + $0x70] sm:$0xff]  ;;  %v43_v28 = vld [vmem:[%s596_s1 + $0x28] sm:$0xff] }
   0x7   :  { %399 = vmatpush1.bf16.msra.mxu1 %v398_v14  ;;  %v394_v23 = vpack.c.bf16 %v33_v21, %v29_v20  ;;  %393 = vmatprep.subr.bf16.mxu0 %v392_v18  ;;  %v402_v26 = vpack.c.bf16 %v35_v24, %v31_v22  ;;  %v20_v27 = vld [vmem:[%s597_s2] sm:$0xff]  ;;  %v41_v29 = vld [vmem:[%s596_s1 + $0x18] sm:$0xff]  ;;  %v404_v31 = vpack.c.bf16 %v43_v28, %v39_v25  ;;  %v40_v35 = vld [vmem:[%s596_s1 + $0x10] sm:$0xff] }
   0x8   :  { %401 = vmatprep.subr.bf16.mxu1 %v400_v19  ;;  %v45_v30 = vld [vmem:[%s596_s1 + $0x38] sm:$0xff]  ;;  %v38_v33 = vld [vmem:[%s596_s1] sm:$0xff]  ;;  %v44_v37 = vld [vmem:[%s596_s1 + $0x30] sm:$0xff] }
   0x9   :  { %v412_v32 = vpack.c.bf16 %v45_v30, %v41_v29  ;;  %v42_v34 = vld [vmem:[%s596_s1 + $0x20] sm:$0xff]  ;;  %v47_v38 = vld [vmem:[%s596_s1 + $0x48] sm:$0xff]  ;;  %v414_v40 = vpack.c.bf16 %v44_v37, %v40_v35  ;;  %v49_v42 = vld [vmem:[%s596_s1 + $0x58] sm:$0xff] }
   0xa   :  { %395 = vmatpush1.bf16.msra.mxu0 %v394_v23  ;;  %v406_v36 = vpack.c.bf16 %v42_v34, %v38_v33  ;;  %v51_v39 = vld [vmem:[%s596_s1 + $0x68] sm:$0xff]  ;;  %v53_v43 = vld [vmem:[%s596_s1 + $0x78] sm:$0xff]  ;;  %v46_v44 = vld [vmem:[%s596_s1 + $0x40] sm:$0xff] }
   0xb   :  { %403 = vmatpush1.bf16.msra.mxu1 %v402_v26  ;;  %405 = vmatprep.subr.bf16.mxu0 %v404_v31  ;;  %v408_v41 = vpack.c.bf16 %v51_v39, %v47_v38  ;;  %v416_v45 = vpack.c.bf16 %v53_v43, %v49_v42  ;;  %v50_v46 = vld [vmem:[%s596_s1 + $0x60] sm:$0xff]  ;;  %v48_v47 = vld [vmem:[%s596_s1 + $0x50] sm:$0xff]  ;;  %v381_v53 = vld [vmem:[%s598_s4 + $0x8] sm:$0xff] }
   0xc   :  { %413 = vmatprep.subr.bf16.mxu1 %v412_v32  ;;  %v52_v48 = vld [vmem:[%s596_s1 + $0x70] sm:$0xff]  ;;  %v410_v49 = vpack.c.bf16 %v50_v46, %v46_v44  ;;  %v54_v50 = vld [vmem:[%s598_s4] sm:$0xff] }
   0xd   :  { %379 = vmatmul.mubr.msk.f32.vlgmr.msra.gmra.mrb[0].mxu0 %vm60_vm0, %v20_v27  ;;  %v418_v51 = vpack.c.bf16 %v52_v48, %v48_v47  ;;  %57 = vperm.xlu0 %422, %v54_v50   ;;  %v37_v52 = vld [vmem:[%s599_s3] sm:$0xff] }
   0xe   :  { %380 = vmatmul.mubr.msk.f32.vlgmr.msra.gmra.mrb[0].mxu1 %vm60_vm0, %v20_v27  ;;  %407 = vmatpush1.bf16.msra.mxu0 %v406_v36 }
   0xf   :  { %415 = vmatpush1.bf16.msra.mxu1 %v414_v40  ;;  %409 = vmatprep.subr.bf16.mxu0 %v408_v41 }
  0x10   :  { %417 = vmatprep.subr.bf16.mxu1 %v416_v45  ;;  %288 = vmatprep.mubr.f32.mxu0 %v423_v3 }
  0x11   :  { %359 = vmatprep.mubr.f32.mxu1 %v423_v3  ;;  %218 = vperm.xlu0 %422, %v381_v53  }
  0x12   :  { %411 = vmatpush1.bf16.msra.mxu0 %v410_v49 }
  0x13   :  { %419 = vmatpush1.bf16.msra.mxu1 %v418_v51 }
  0x15   :  { %382 = vmatmul.mubr.msk.f32.vlgmr.msra.gmra.mrb[2].mxu0 %vm60_vm0, %v37_v52 }
  0x16   :  { %383 = vmatmul.mubr.msk.f32.vlgmr.msra.gmra.mrb[2].mxu1 %vm60_vm0, %v37_v52 }
  0x8c   :  { %v58_v54 = vpop.permute.xlu0 %57 }
  0x90   :  { %v219_v3 = vpop.permute.xlu0 %218 }
  0xe0   :  { %v130_v55 = vpop.f32.mrb[0].mxu0 }
  0xe1   :  { %v201_v56 = vpop.f32.mrb[0].mxu1  ;;  %v131_v57 = vadd.f32 %v130_v55, %v58_v54  ;;  %v132_v58 = vpop.f32.mrb[1].mxu0 }
  0xe2   :  { %v202_v59 = vadd.f32 %v201_v56, %v58_v54  ;;  %v133_v60 = vadd.f32 %v132_v58, %v58_v54  ;;  %v203_v61 = vpop.f32.mrb[1].mxu1 }
  0xe3   :  { %v206_v62 = vmax.f32 %v131_v57, 0.0  ;;  %v204_v63 = vadd.f32 %v203_v61, %v58_v54 }
  0xe4   :  { %v208_v0 = vmax.f32 %v202_v59, 0.0  ;;  %v207_v1 = vmax.f32 %v133_v60, 0.0 }
  0xe5   :  { %210 = vst [vmem:[%s600_s5] sm:$0xff] %v206_v62  ;;  %v209_v2 = vmax.f32 %v204_v63, 0.0 }
  0xe6   :  { %212 = vst [vmem:[%s600_s5 + $0x10] sm:$0xff] %v208_v0  ;;  %211 = vst [vmem:[%s600_s5 + $0x8] sm:$0xff] %v207_v1 }
  0xe7   :  { %213 = vst [vmem:[%s600_s5 + $0x18] sm:$0xff] %v209_v2 }
  0xe8   :  { %v290_v4 = vpop.f32.mrb[2].mxu0 }
  0xe9   :  { %v291_v5 = vadd.f32 %v290_v4, %v219_v3  ;;  %v361_v6 = vpop.f32.mrb[2].mxu1  ;;  %v292_v7 = vpop.f32.mrb[3].mxu0 }
  0xea   :  { %v362_v8 = vadd.f32 %v361_v6, %v219_v3  ;;  %v293_v9 = vadd.f32 %v292_v7, %v219_v3  ;;  %v363_v10 = vpop.f32.mrb[3].mxu1 }
  0xeb   :  { %v366_v11 = vmax.f32 %v291_v5, 0.0  ;;  %v364_v12 = vadd.f32 %v363_v10, %v219_v3 }
  0xec   :  { %v368_v13 = vmax.f32 %v362_v8, 0.0  ;;  %v367_v14 = vmax.f32 %v293_v9, 0.0 }
  0xed   :  { %384 = vst [vmem:[%s600_s5 + $0x20] sm:$0xff] %v366_v11  ;;  %v369_v15 = vmax.f32 %v364_v12, 0.0 }
  0xee   :  { %386 = vst [vmem:[%s600_s5 + $0x30] sm:$0xff] %v368_v13  ;;  %385 = vst [vmem:[%s600_s5 + $0x28] sm:$0xff] %v367_v14 }
  0xef   :  { %387 = vst [vmem:[%s600_s5 + $0x38] sm:$0xff] %v369_v15 }

// kernel: cross_stitch_forward.7
= control target key start
LH: loop header
LB: loop body
LE: loop exit
PB: predicated region body
PF: predicated region fallthrough
CT: control target
= control target key end

     0   :  { %v62_v0 = vmov 0   ;;  %s102_s1 = inlined_call_operand.vmem [shape: f32[4,8,1], index: 1, kind: input, shape index: {}]   ;;  %s103_s0 = inlined_call_operand.vmem [shape: f32[2,8,128], index: 0, kind: input, shape index: {}]   ;;  %s104_s2 = inlined_call_operand.vmem [shape: f32[2,8,128], index: 2, kind: output, shape index: {}]  }
   0x1   :  { %61 = vset.pattern.permute.xlu1 %v62_v0  ;;  %60 = vset.pattern.permute.xlu0 %v62_v0  ;;  %v56_v1 = vld [vmem:[%s102_s1 + $0x10] sm:$0xff]  ;;  %v14_v2 = vld [vmem:[%s102_s1] sm:$0xff]  ;;  %v57_v3 = vld [vmem:[%s102_s1 + $0x18] sm:$0xff] }
   0x2   :  { %35 = vperm.xlu1 %61, %v56_v1   ;;  %17 = vperm.xlu0 %60, %v14_v2   ;;  %v55_v4 = vld [vmem:[%s102_s1 + $0x8] sm:$0xff]  ;;  %v11_v7 = vld [vmem:[%s103_s0] sm:$0xff] }
   0x3   :  { %v54_v8 = vld [vmem:[%s103_s0 + $0x8] sm:$0xff] }
   0x6   :  { %43 = vperm.xlu1 %61, %v57_v3   ;;  %25 = vperm.xlu0 %60, %v55_v4  }
  0x81   :  { %v36_v5 = vpop.permute.xlu1 %35  ;;  %v18_v6 = vpop.permute.xlu0 %17 }
  0x82   :  { %v38_v11 = vmul.f32 %v36_v5, %v11_v7  ;;  %v20_v12 = vmul.f32 %v18_v6, %v11_v7 }
  0x85   :  { %v44_v9 = vpop.permute.xlu1 %43  ;;  %v26_v10 = vpop.permute.xlu0 %25 }
  0x86   :  { %v46_v13 = vmul.f32 %v54_v8, %v44_v9  ;;  %v28_v14 = vmul.f32 %v54_v8, %v26_v10 }
  0x88   :  { %v47_v15 = vadd.f32 %v46_v13, %v38_v11  ;;  %v29_v16 = vadd.f32 %v28_v14, %v20_v12 }
  0x8a   :  { %58 = vst [vmem:[%s104_s2 + $0x8] sm:$0xff] %v47_v15  ;;  %30 = vst [vmem:[%s104_s2] sm:$0xff] %v29_v16 }

// kernel: squeeze.7
= control target key start
LH: loop header
LB: loop body
LE: loop exit
PB: predicated region body
PF: predicated region fallthrough
CT: control target
= control target key end

     0   :  { %vm3_vm0 = vcmask 64512   ;;  %s264_s8 = smov 104   ;;  %s265_s17 = smov 112   ;;  %s547_s0 = inlined_call_operand.vmem [shape: f32[1,8,128], index: 0, kind: input, shape index: {}]   ;;  %s548_s1 = inlined_call_operand.vmem [shape: f32[8,2,8,8], index: 1, kind: output, shape index: {}]  }
   0x1   :  { %v8_v0 = vld [vmem:[%s547_s0] sm:$0xff]   ;;  %s263_s0 = smov 120   ;;  %s266_s18 = smov 96  }
   0x2   :  { %9 = vrot.lane.b32.xlu0 %v8_v0, %s263_s0  ;;  %33 = vrot.lane.b32.xlu1 %v8_v0, %s264_s8  ;;  %4 = vst.msk [vmem:[%s548_s1] ss:$16 sm:$0x3] %vm3_vm0, %v8_v0   ;;  %5 = vst.msk [vmem:[%s548_s1] ss:$16 sm:$0xc] %vm3_vm0, %v8_v0  }
   0x3   :  { %6 = vst.msk [vmem:[%s548_s1] ss:$16 sm:$0x30] %vm3_vm0, %v8_v0   ;;  %7 = vst.msk [vmem:[%s548_s1] ss:$16 sm:$0xc0] %vm3_vm0, %v8_v0  }
   0x4   :  { %s267_s19 = smov 88   ;;  %s268_s20 = smov 80  }
   0x5   :  { %s269_s21 = smov 72   ;;  %s270_s22 = smov 64  }
   0x6   :  { %21 = vrot.lane.b32.xlu0 %v8_v0, %s265_s17  ;;  %45 = vrot.lane.b32.xlu1 %v8_v0, %s266_s18  ;;  %s271_s23 = smov 56   ;;  %s272_s24 = smov 48  }
   0x7   :  { %s273_s25 = smov 40   ;;  %s274_s26 = smov 32  }
   0x8   :  { %s275_s27 = smov 24   ;;  %s276_s28 = smov 16  }
   0x9   :  { %s277_s29 = smov 8  }
   0xa   :  { %57 = vrot.lane.b32.xlu0 %v8_v0, %s267_s19  ;;  %69 = vrot.lane.b32.xlu1 %v8_v0, %s268_s20 }
   0xe   :  { %81 = vrot.lane.b32.xlu0 %v8_v0, %s269_s21  ;;  %93 = vrot.lane.b32.xlu1 %v8_v0, %s270_s22 }
  0x12   :  { %105 = vrot.lane.b32.xlu0 %v8_v0, %s271_s23  ;;  %117 = vrot.lane.b32.xlu1 %v8_v0, %s272_s24 }
  0x16   :  { %129 = vrot.lane.b32.xlu0 %v8_v0, %s273_s25  ;;  %141 = vrot.lane.b32.xlu1 %v8_v0, %s274_s26 }
  0x1a   :  { %153 = vrot.lane.b32.xlu0 %v8_v0, %s275_s27  ;;  %165 = vrot.lane.b32.xlu1 %v8_v0, %s276_s28 }
  0x1e   :  { %177 = vrot.lane.b32.xlu0 %v8_v0, %s277_s29 }
  0x74   :  { %v10_v1 = vpop.permute.xlu0 %9   ;;  %v34_v2 = vpop.permute.xlu1 %33  }
  0x75   :  { %188 = vst.msk [vmem:[%s548_s1 + $0x1] ss:$16 sm:$0x3] %vm3_vm0, %v10_v1   ;;  %189 = vst.msk [vmem:[%s548_s1 + $0x1] ss:$16 sm:$0xc] %vm3_vm0, %v10_v1  }
  0x76   :  { %190 = vst.msk [vmem:[%s548_s1 + $0x1] ss:$16 sm:$0x30] %vm3_vm0, %v10_v1   ;;  %191 = vst.msk [vmem:[%s548_s1 + $0x1] ss:$16 sm:$0xc0] %vm3_vm0, %v10_v1  }
  0x77   :  { %196 = vst.msk [vmem:[%s548_s1 + $0x3] ss:$16 sm:$0x3] %vm3_vm0, %v34_v2   ;;  %197 = vst.msk [vmem:[%s548_s1 + $0x3] ss:$16 sm:$0xc] %vm3_vm0, %v34_v2  }
  0x78   :  { %198 = vst.msk [vmem:[%s548_s1 + $0x3] ss:$16 sm:$0x30] %vm3_vm0, %v34_v2   ;;  %199 = vst.msk [vmem:[%s548_s1 + $0x3] ss:$16 sm:$0xc0] %vm3_vm0, %v34_v2   ;;  %v22_v3 = vpop.permute.xlu0 %21   ;;  %v46_v4 = vpop.permute.xlu1 %45  }
  0x79   :  { %192 = vst.msk [vmem:[%s548_s1 + $0x2] ss:$16 sm:$0x3] %vm3_vm0, %v22_v3   ;;  %193 = vst.msk [vmem:[%s548_s1 + $0x2] ss:$16 sm:$0xc] %vm3_vm0, %v22_v3  }
  0x7a   :  { %194 = vst.msk [vmem:[%s548_s1 + $0x2] ss:$16 sm:$0x30] %vm3_vm0, %v22_v3   ;;  %195 = vst.msk [vmem:[%s548_s1 + $0x2] ss:$16 sm:$0xc0] %vm3_vm0, %v22_v3  }
  0x7b   :  { %200 = vst.msk [vmem:[%s548_s1 + $0x4] ss:$16 sm:$0x3] %vm3_vm0, %v46_v4   ;;  %201 = vst.msk [vmem:[%s548_s1 + $0x4] ss:$16 sm:$0xc] %vm3_vm0, %v46_v4  }
  0x7c   :  { %202 = vst.msk [vmem:[%s548_s1 + $0x4] ss:$16 sm:$0x30] %vm3_vm0, %v46_v4   ;;  %203 = vst.msk [vmem:[%s548_s1 + $0x4] ss:$16 sm:$0xc0] %vm3_vm0, %v46_v4   ;;  %v58_v5 = vpop.permute.xlu0 %57   ;;  %v70_v6 = vpop.permute.xlu1 %69  }
  0x7d   :  { %204 = vst.msk [vmem:[%s548_s1 + $0x5] ss:$16 sm:$0x3] %vm3_vm0, %v58_v5   ;;  %205 = vst.msk [vmem:[%s548_s1 + $0x5] ss:$16 sm:$0xc] %vm3_vm0, %v58_v5  }
  0x7e   :  { %206 = vst.msk [vmem:[%s548_s1 + $0x5] ss:$16 sm:$0x30] %vm3_vm0, %v58_v5   ;;  %207 = vst.msk [vmem:[%s548_s1 + $0x5] ss:$16 sm:$0xc0] %vm3_vm0, %v58_v5  }
  0x7f   :  { %208 = vst.msk [vmem:[%s548_s1 + $0x6] ss:$16 sm:$0x3] %vm3_vm0, %v70_v6   ;;  %209 = vst.msk [vmem:[%s548_s1 + $0x6] ss:$16 sm:$0xc] %vm3_vm0, %v70_v6  }
  0x80   :  { %210 = vst.msk [vmem:[%s548_s1 + $0x6] ss:$16 sm:$0x30] %vm3_vm0, %v70_v6   ;;  %211 = vst.msk [vmem:[%s548_s1 + $0x6] ss:$16 sm:$0xc0] %vm3_vm0, %v70_v6   ;;  %v82_v7 = vpop.permute.xlu0 %81   ;;  %v94_v8 = vpop.permute.xlu1 %93  }
  0x81   :  { %212 = vst.msk [vmem:[%s548_s1 + $0x7] ss:$16 sm:$0x3] %vm3_vm0, %v82_v7   ;;  %213 = vst.msk [vmem:[%s548_s1 + $0x7] ss:$16 sm:$0xc] %vm3_vm0, %v82_v7  }
  0x82   :  { %214 = vst.msk [vmem:[%s548_s1 + $0x7] ss:$16 sm:$0x30] %vm3_vm0, %v82_v7   ;;  %215 = vst.msk [vmem:[%s548_s1 + $0x7] ss:$16 sm:$0xc0] %vm3_vm0, %v82_v7  }
  0x83   :  { %216 = vst.msk [vmem:[%s548_s1 + $0x8] ss:$16 sm:$0x3] %vm3_vm0, %v94_v8   ;;  %217 = vst.msk [vmem:[%s548_s1 + $0x8] ss:$16 sm:$0xc] %vm3_vm0, %v94_v8  }
  0x84   :  { %218 = vst.msk [vmem:[%s548_s1 + $0x8] ss:$16 sm:$0x30] %vm3_vm0, %v94_v8   ;;  %219 = vst.msk [vmem:[%s548_s1 + $0x8] ss:$16 sm:$0xc0] %vm3_vm0, %v94_v8   ;;  %v106_v9 = vpop.permute.xlu0 %105   ;;  %v118_v10 = vpop.permute.xlu1 %117  }
  0x85   :  { %220 = vst.msk [vmem:[%s548_s1 + $0x9] ss:$16 sm:$0x3] %vm3_vm0, %v106_v9   ;;  %221 = vst.msk [vmem:[%s548_s1 + $0x9] ss:$16 sm:$0xc] %vm3_vm0, %v106_v9  }
  0x86   :  { %222 = vst.msk [vmem:[%s548_s1 + $0x9] ss:$16 sm:$0x30] %vm3_vm0, %v106_v9   ;;  %223 = vst.msk [vmem:[%s548_s1 + $0x9] ss:$16 sm:$0xc0] %vm3_vm0, %v106_v9  }
  0x87   :  { %224 = vst.msk [vmem:[%s548_s1 + $0xa] ss:$16 sm:$0x3] %vm3_vm0, %v118_v10   ;;  %225 = vst.msk [vmem:[%s548_s1 + $0xa] ss:$16 sm:$0xc] %vm3_vm0, %v118_v10  }
  0x88   :  { %226 = vst.msk [vmem:[%s548_s1 + $0xa] ss:$16 sm:$0x30] %vm3_vm0, %v118_v10   ;;  %227 = vst.msk [vmem:[%s548_s1 + $0xa] ss:$16 sm:$0xc0] %vm3_vm0, %v118_v10   ;;  %v130_v11 = vpop.permute.xlu0 %129   ;;  %v142_v12 = vpop.permute.xlu1 %141  }
  0x89   :  { %228 = vst.msk [vmem:[%s548_s1 + $0xb] ss:$16 sm:$0x3] %vm3_vm0, %v130_v11   ;;  %229 = vst.msk [vmem:[%s548_s1 + $0xb] ss:$16 sm:$0xc] %vm3_vm0, %v130_v11  }
  0x8a   :  { %230 = vst.msk [vmem:[%s548_s1 + $0xb] ss:$16 sm:$0x30] %vm3_vm0, %v130_v11   ;;  %231 = vst.msk [vmem:[%s548_s1 + $0xb] ss:$16 sm:$0xc0] %vm3_vm0, %v130_v11  }
  0x8b   :  { %232 = vst.msk [vmem:[%s548_s1 + $0xc] ss:$16 sm:$0x3] %vm3_vm0, %v142_v12   ;;  %233 = vst.msk [vmem:[%s548_s1 + $0xc] ss:$16 sm:$0xc] %vm3_vm0, %v142_v12  }
  0x8c   :  { %234 = vst.msk [vmem:[%s548_s1 + $0xc] ss:$16 sm:$0x30] %vm3_vm0, %v142_v12   ;;  %235 = vst.msk [vmem:[%s548_s1 + $0xc] ss:$16 sm:$0xc0] %vm3_vm0, %v142_v12   ;;  %v154_v13 = vpop.permute.xlu0 %153   ;;  %v166_v14 = vpop.permute.xlu1 %165  }
  0x8d   :  { %236 = vst.msk [vmem:[%s548_s1 + $0xd] ss:$16 sm:$0x3] %vm3_vm0, %v154_v13   ;;  %237 = vst.msk [vmem:[%s548_s1 + $0xd] ss:$16 sm:$0xc] %vm3_vm0, %v154_v13  }
  0x8e   :  { %238 = vst.msk [vmem:[%s548_s1 + $0xd] ss:$16 sm:$0x30] %vm3_vm0, %v154_v13   ;;  %239 = vst.msk [vmem:[%s548_s1 + $0xd] ss:$16 sm:$0xc0] %vm3_vm0, %v154_v13  }
  0x8f   :  { %240 = vst.msk [vmem:[%s548_s1 + $0xe] ss:$16 sm:$0x3] %vm3_vm0, %v166_v14   ;;  %241 = vst.msk [vmem:[%s548_s1 + $0xe] ss:$16 sm:$0xc] %vm3_vm0, %v166_v14  }
  0x90   :  { %242 = vst.msk [vmem:[%s548_s1 + $0xe] ss:$16 sm:$0x30] %vm3_vm0, %v166_v14   ;;  %243 = vst.msk [vmem:[%s548_s1 + $0xe] ss:$16 sm:$0xc0] %vm3_vm0, %v166_v14   ;;  %v178_v15 = vpop.permute.xlu0 %177  }
  0x91   :  { %244 = vst.msk [vmem:[%s548_s1 + $0xf] ss:$16 sm:$0x3] %vm3_vm0, %v178_v15   ;;  %245 = vst.msk [vmem:[%s548_s1 + $0xf] ss:$16 sm:$0xc] %vm3_vm0, %v178_v15  }
  0x92   :  { %246 = vst.msk [vmem:[%s548_s1 + $0xf] ss:$16 sm:$0x30] %vm3_vm0, %v178_v15   ;;  %247 = vst.msk [vmem:[%s548_s1 + $0xf] ss:$16 sm:$0xc0] %vm3_vm0, %v178_v15  }

// kernel: cross_stitch_forward.8
= control target key start
LH: loop header
LB: loop body
LE: loop exit
PB: predicated region body
PF: predicated region fallthrough
CT: control target
= control target key end

     0   :  { %v350_v3 = vmov 0   ;;  %vm54_vm0 = vcmask 588800   ;;  %s475_s0 = inlined_call_operand.vmem [shape: f32[72,128], index: 0, kind: input, shape index: {}]   ;;  %s476_s1 = inlined_call_operand.vmem [shape: f32[72,128], index: 1, kind: input, shape index: {}]   ;;  %s477_s2 = inlined_call_operand.vmem [shape: f32[16,72], index: 2, kind: input, shape index: {}]   ;;  %s478_s3 = inlined_call_operand.vmem [shape: f32[16,72], index: 3, kind: input, shape index: {}]   ;;  %s479_s4 = inlined_call_operand.vmem [shape: f32[2,16,1], index: 4, kind: input, shape index: {}]   ;;  %s480_s5 = inlined_call_operand.vmem [shape: f32[2,16,128], index: 5, kind: output, shape index: {}]  }
   0x1   :  { %v22_v0 = vld [vmem:[%s475_s0] sm:$0xff]  ;;  %v23_v1 = vld [vmem:[%s475_s0 + $0x8] sm:$0xff]  ;;  %349 = vset.pattern.permute.xlu1 %v350_v3  ;;  %348 = vset.pattern.permute.xlu0 %v350_v3  ;;  %v24_v6 = vld [vmem:[%s475_s0 + $0x10] sm:$0xff] }
   0x2   :  { %v33_v2 = vld [vmem:[%s476_s1] sm:$0xff]  ;;  %v315_v4 = vpack.c.bf16 %v23_v1, %v22_v0  ;;  %v34_v5 = vld [vmem:[%s476_s1 + $0x8] sm:$0xff]  ;;  %v25_v7 = vld [vmem:[%s475_s0 + $0x18] sm:$0xff] }
   0x3   :  { %v331_v8 = vpack.c.bf16 %v34_v5, %v33_v2  ;;  %v319_v9 = vpack.c.bf16 %v25_v7, %v24_v6  ;;  %v35_v10 = vld [vmem:[%s476_s1 + $0x10] sm:$0xff]  ;;  %v36_v11 = vld [vmem:[%s476_s1 + $0x18] sm:$0xff]  ;;  %v26_v12 = vld [vmem:[%s475_s0 + $0x20] sm:$0xff] }
   0x4   :  { %316 = vmatprep.subr.bf16.mxu0 %v315_v4  ;;  %v335_v13 = vpack.c.bf16 %v36_v11, %v35_v10  ;;  %v27_v14 = vld [vmem:[%s475_s0 + $0x28] sm:$0xff]  ;;  %v37_v15 = vld [vmem:[%s476_s1 + $0x20] sm:$0xff]  ;;  %v28_v18 = vld [vmem:[%s475_s0 + $0x30] sm:$0xff] }
   0x5   :  { %v38_v16 = vld [vmem:[%s476_s1 + $0x28] sm:$0xff]  ;;  %332 = vmatprep.subr.bf16.mxu1 %v331_v8  ;;  %318 = vmatpush3.bf16.msra.mxu0 %v315_v4  ;;  %v323_v17 = vpack.c.bf16 %v27_v14, %v26_v12  ;;  %v29_v19 = vld [vmem:[%s475_s0 + $0x38] sm:$0xff]  ;;  %v39_v21 = vld [vmem:[%s476_s1 + $0x30] sm:$0xff] }
   0x6   :  { %334 = vmatpush3.bf16.msra.mxu1 %v331_v8  ;;  %320 = vmatprep.subr.bf16.mxu0 %v319_v9  ;;  %v339_v20 = vpack.c.bf16 %v38_v16, %v37_v15  ;;  %v20_v22 = vld [vmem:[%s477_s2] sm:$0xff]  ;;  %v40_v24 = vld [vmem:[%s476_s1 + $0x38] sm:$0xff]  ;;  %v245_v25 = vld [vmem:[%s479_s4 + $0x10] sm:$0xff]  ;;  %v327_v27 = vpack.c.bf16 %v29_v19, %v28_v18 }
   0x7   :  { %336 = vmatprep.subr.bf16.mxu1 %v335_v13  ;;  %v31_v23 = vld [vmem:[%s478_s3] sm:$0xff]  ;;  %291 = vmatprep.mubr.msk.f32.mxu0 %vm54_vm0, %v20_v22  ;;  %v246_v28 = vld [vmem:[%s479_s4 + $0x18] sm:$0xff]  ;;  %v343_v29 = vpack.c.bf16 %v40_v24, %v39_v21  ;;  %v43_v30 = vld [vmem:[%s479_s4 + $0x8] sm:$0xff] }
   0x8   :  { %312 = vmatprep.mubr.msk.f32.mxu1 %vm54_vm0, %v31_v23  ;;  %v42_v26 = vld [vmem:[%s479_s4] sm:$0xff]  ;;  %145 = vperm.xlu1 %349, %v245_v25   ;;  %v21_v33 = vld [vmem:[%s477_s2 + $0x8] sm:$0xff] }
   0x9   :  { %322 = vmatpush3.bf16.msra.mxu0 %v319_v9  ;;  %46 = vperm.xlu0 %348, %v42_v26   ;;  %v30_v31 = vld [vmem:[%s475_s0 + $0x40] sm:$0xff]  ;;  %v32_v34 = vld [vmem:[%s478_s3 + $0x8] sm:$0xff] }
   0xa   :  { %338 = vmatpush3.bf16.msra.mxu1 %v335_v13  ;;  %324 = vmatprep.subr.bf16.mxu0 %v323_v17  ;;  %v41_v32 = vld [vmem:[%s476_s1 + $0x40] sm:$0xff] }
   0xb   :  { %340 = vmatprep.subr.bf16.mxu1 %v339_v20 }
   0xc   :  { %150 = vperm.xlu1 %349, %v246_v28  }
   0xd   :  { %326 = vmatpush3.bf16.msra.mxu0 %v323_v17  ;;  %51 = vperm.xlu0 %348, %v43_v30  }
   0xe   :  { %342 = vmatpush3.bf16.msra.mxu1 %v339_v20  ;;  %328 = vmatprep.subr.bf16.mxu0 %v327_v27 }
   0xf   :  { %344 = vmatprep.subr.bf16.mxu1 %v343_v29 }
  0x11   :  { %330 = vmatpush3.bf16.msra.mxu0 %v327_v27 }
  0x12   :  { %346 = vmatpush3.bf16.msra.mxu1 %v343_v29  ;;  %289 = vmatprep.subr.mxu0 %v30_v31 }
  0x13   :  { %310 = vmatprep.subr.mxu1 %v41_v32 }
  0x15   :  { %290 = vmatpush3.msra.mxu0 %v30_v31 }
  0x16   :  { %311 = vmatpush3.msra.mxu1 %v41_v32  ;;  %292 = vmatmul.mubr.msk.f32.vlgmr.msra.gmra.mrb[0].mxu0 %vm54_vm0, %v21_v33 }
  0x17   :  { %313 = vmatmul.mubr.msk.f32.vlgmr.msra.gmra.mrb[0].mxu1 %vm54_vm0, %v32_v34 }
  0x87   :  { %v146_v35 = vpop.permute.xlu1 %145 }
  0x88   :  { %v47_v36 = vpop.permute.xlu0 %46 }
  0x8b   :  { %v151_v37 = vpop.permute.xlu1 %150 }
  0x8c   :  { %v52_v38 = vpop.permute.xlu0 %51 }
  0xe9   :  { %v293_v39 = vpop.f32.mrb[0].mxu0 }
  0xea   :  { %v133_v40 = vadd.f32 %v293_v39, %v52_v38  ;;  %v314_v41 = vpop.f32.mrb[0].mxu1  ;;  %v127_v42 = vpop.f32.mrb[1].mxu0 }
  0xeb   :  { %v231_v43 = vadd.f32 %v314_v41, %v151_v37  ;;  %v128_v44 = vadd.f32 %v127_v42, %v47_v36  ;;  %v225_v45 = vpop.f32.mrb[1].mxu1 }
  0xec   :  { %v137_v46 = vmax.f32 %v133_v40, 0.0  ;;  %v226_v47 = vadd.f32 %v225_v45, %v146_v35 }
  0xed   :  { %v235_v48 = vmax.f32 %v231_v43, 0.0  ;;  %v136_v49 = vmax.f32 %v128_v44, 0.0 }
  0xee   :  { %139 = vst [vmem:[%s480_s5 + $0x8] sm:$0xff] %v137_v46  ;;  %v234_v50 = vmax.f32 %v226_v47, 0.0 }
  0xef   :  { %250 = vst [vmem:[%s480_s5 + $0x18] sm:$0xff] %v235_v48  ;;  %138 = vst [vmem:[%s480_s5] sm:$0xff] %v136_v49 }
  0xf0   :  { %249 = vst [vmem:[%s480_s5 + $0x10] sm:$0xff] %v234_v50 }

// kernel: cross_stitch_forward.9
= control target key start
LH: loop header
LB: loop body
LE: loop exit
PB: predicated region body
PF: predicated region fallthrough
CT: control target
= control target key end

     0   :  { %v102_v0 = vmov 0   ;;  %vm47_vm0 = vcmask 261120   ;;  %s170_s1 = inlined_call_operand.vmem [shape: f32[4,16,1], index: 1, kind: input, shape index: {}]   ;;  %s171_s0 = inlined_call_operand.vmem [shape: f32[2,16,32], index: 0, kind: input, shape index: {}]   ;;  %s172_s2 = inlined_call_operand.vmem [shape: f32[2,16,32], index: 2, kind: output, shape index: {}]  }
   0x1   :  { %101 = vset.pattern.permute.xlu1 %v102_v0  ;;  %100 = vset.pattern.permute.xlu0 %v102_v0  ;;  %v91_v1 = vld [vmem:[%s170_s1 + $0x10] sm:$0xff]  ;;  %v16_v2 = vld [vmem:[%s170_s1] sm:$0xff]  ;;  %v92_v3 = vld [vmem:[%s170_s1 + $0x18] sm:$0xff] }
   0x2   :  { %35 = vperm.xlu1 %101, %v91_v1   ;;  %20 = vperm.xlu0 %100, %v16_v2   ;;  %v17_v4 = vld [vmem:[%s170_s1 + $0x8] sm:$0xff]  ;;  %v93_v6 = vld [vmem:[%s170_s1 + $0x20] sm:$0xff]  ;;  %v96_v7 = vld [vmem:[%s170_s1 + $0x38] sm:$0xff] }
   0x3   :  { %v94_v5 = vld [vmem:[%s170_s1 + $0x28] sm:$0xff]  ;;  %v95_v8 = vld [vmem:[%s170_s1 + $0x30] sm:$0xff]  ;;  %v11_v10 = vld [vmem:[%s171_s0] sm:$0xff] }
   0x4   :  { %v89_v9 = vld [vmem:[%s171_s0 + $0x10] sm:$0xff]  ;;  %v90_v15 = vld [vmem:[%s171_s0 + $0x18] sm:$0xff]  ;;  %v12_v16 = vld [vmem:[%s171_s0 + $0x8] sm:$0xff] }
   0x6   :  { %40 = vperm.xlu1 %101, %v92_v3   ;;  %25 = vperm.xlu0 %100, %v17_v4  }
   0xa   :  { %60 = vperm.xlu1 %101, %v94_v5   ;;  %55 = vperm.xlu0 %100, %v93_v6  }
   0xe   :  { %75 = vperm.xlu1 %101, %v96_v7   ;;  %70 = vperm.xlu0 %100, %v95_v8  }
  0x81   :  { %v36_v11 = vpop.permute.xlu1 %35  ;;  %v21_v12 = vpop.permute.xlu0 %20 }
  0x82   :  { %v43_v13 = vmul.f32 %v89_v9, %v36_v11  ;;  %v28_v14 = vmul.f32 %v21_v12, %v11_v10 }
  0x84   :  { %v45_v17 = vadd.f32 %v43_v13, %v28_v14 }
  0x85   :  { %v41_v18 = vpop.permute.xlu1 %40  ;;  %v26_v19 = vpop.permute.xlu0 %25 }
  0x86   :  { %48 = vst.msk [vmem:[%s172_s2] sm:$0xff] %vm47_vm0, %v45_v17  ;;  %v44_v20 = vmul.f32 %v90_v15, %v41_v18  ;;  %v29_v21 = vmul.f32 %v26_v19, %v12_v16 }
  0x88   :  { %v46_v22 = vadd.f32 %v44_v20, %v29_v21 }
  0x89   :  { %v61_v23 = vpop.permute.xlu1 %60  ;;  %v56_v24 = vpop.permute.xlu0 %55 }
  0x8a   :  { %49 = vst.msk [vmem:[%s172_s2 + $0x8] sm:$0xff] %vm47_vm0, %v46_v22  ;;  %v64_v27 = vmul.f32 %v61_v23, %v12_v16  ;;  %v63_v28 = vmul.f32 %v56_v24, %v11_v10 }
  0x8d   :  { %v76_v25 = vpop.permute.xlu1 %75  ;;  %v71_v26 = vpop.permute.xlu0 %70 }
  0x8e   :  { %v79_v29 = vmul.f32 %v90_v15, %v76_v25  ;;  %v78_v30 = vmul.f32 %v89_v9, %v71_v26 }
  0x90   :  { %v81_v31 = vadd.f32 %v79_v29, %v64_v27  ;;  %v80_v32 = vadd.f32 %v78_v30, %v63_v28 }
  0x92   :  { %98 = vst.msk [vmem:[%s172_s2 + $0x18] sm:$0xff] %vm47_vm0, %v81_v31  ;;  %97 = vst.msk [vmem:[%s172_s2 + $0x10] sm:$0xff] %vm47_vm0, %v80_v32 }

// kernel: cross_stitch_forward.11
= control target key start
LH: loop header
LB: loop body
LE: loop exit
PB: predicated region body
PF: predicated region fallthrough
CT: control target
= control target key end

     0   :  { %10 = vsyncpa [#allocation3], 0  ;;  %s380_s0 = inlined_call_operand.vmem [shape: f32[2,2,32], index: 0, kind: input, shape index: {}]   ;;  %s381_s1 = inlined_call_operand.vmem [shape: f32[32,10], index: 1, kind: input, shape index: {}]   ;;  %s382_s2 = inlined_call_operand.vmem [shape: f32[32,10], index: 2, kind: input, shape index: {}]   ;;  %s383_s3 = inlined_call_operand.vmem [shape: f32[2,1,10], index: 3, kind: input, shape index: {}]   ;;  %s384_s4 = inlined_call_operand.vmem [shape: f32[4], index: 4, kind: input, shape index: {}]   ;;  %s385_s5 = inlined_call_operand.vmem [shape: f32[2,2,10], index: 5, kind: output, shape index: {}]  }
   0x1   :  { %s25_s20 = sshll.u32 %s384_s4, 4  ;;  %s26_s20 = int_to_ptr.vmem [resolvable:$true] %s25_s20 }
   0x2   :  { %s287_s21 = scalar_lea.vmem %s26_s20, 16  ;;  %p292_p1 = scmp.lt.s32.totalorder %s26_s20, %s26_s20 }
   0x3   :  { %p288_p0 = scmp.ne.s32.totalorder %s26_s20, %s287_s21  ;;  %p293_p2 = scmp.lt.s32.totalorder %s287_s21, %s287_s21 }
   0x5   :  { %p294_p3 = por %p293_p2, %p292_p1 }
   0x7   :  { %p295_p4 = pnand %p294_p3, %p288_p0 }
   0x9   :  { %298 = shalt.err (!%p295_p4)
}
   0xa   :  { %s301_s22 = smov [#allocation2]  }
   0xb   :  { %28 = dma.vmem_to_smem %s26_s20, 16, %s301_s22, [#allocation3]  }
   0xc   :  { %299 = dma.done.wait [#allocation3], 16  }
   0xd   :  { %300 = vsyncadd [#allocation3], 4294967280 }
   0xe   :  { %32 = sfence }
   0xf   :  { %v34_v0 = vld [vmem:[%s381_s1] sm:$0xff]  ;;  %v35_v1 = vld [vmem:[%s381_s1 + $0x8] sm:$0xff]  ;;  %v302_v3 = vmov 0.0|0.0   ;;  %v36_v6 = vld [vmem:[%s381_s1 + $0x10] sm:$0xff]  ;;  %vm303_vm0 = vmmov 0   ;;  %v304_v11 = vmov 0.0  }
  0x10   :  { %v121_v2 = vld [vmem:[%s382_s2] sm:$0xff]  ;;  %271 = vmatprep.subr.bf16.mxu0 %v302_v3  ;;  %277 = vmatprep.subr.bf16.mxu1 %v302_v3  ;;  %v272_v4 = vpack.c.bf16 %v35_v1, %v34_v0  ;;  %v122_v5 = vld [vmem:[%s382_s2 + $0x8] sm:$0xff]  ;;  %v37_v7 = vld [vmem:[%s381_s1 + $0x18] sm:$0xff]  ;;  %vm45_vm1 = vcmask 261120   ;;  %s236_s16 = sld [smem:[#allocation2 + $0x2]]  ;;  %s235_s17 = sld [smem:[#allocation2 + $0x1]] }
  0x11   :  { %v278_v8 = vpack.c.bf16 %v122_v5, %v121_v2  ;;  %v123_v9 = vld [vmem:[%s382_s2 + $0x10] sm:$0xff]  ;;  %v124_v10 = vld [vmem:[%s382_s2 + $0x18] sm:$0xff]  ;;  %257 = vmatprep.mubr.msk.f32.mxu0 %vm303_vm0, %v304_v11  ;;  %268 = vmatprep.mubr.msk.f32.mxu1 %vm303_vm0, %v304_v11  ;;  %v275_v12 = vpack.c.bf16 %v37_v7, %v36_v6  ;;  %v33_v14 = vld [vmem:[%s380_s0] sm:$0x3]  ;;  %s206_s2 = sld [smem:[#allocation2]]  ;;  %s237_s18 = sld [smem:[#allocation2 + $0x3]] }
  0x12   :  { %273 = vmatpush3.bf16.msra.mxu0 %v272_v4  ;;  %v281_v13 = vpack.c.bf16 %v124_v10, %v123_v9  ;;  %v231_v15 = vld [vmem:[%s380_s0 + $0x2] sm:$0x3]  ;;  %v229_v16 = vld [vmem:[%s383_s3] ss:$0 sm:$0xff]  ;;  %v233_v17 = vld [vmem:[%s383_s3 + $0x1] ss:$0 sm:$0xff] }
  0x13   :  { %279 = vmatpush3.bf16.msra.mxu1 %v278_v8  ;;  %274 = vmatprep.subr.bf16.mxu0 %v302_v3  ;;  %vm220_vm2 = vcmask 74752  }
  0x14   :  { %280 = vmatprep.subr.bf16.mxu1 %v302_v3 }
  0x16   :  { %276 = vmatpush3.bf16.msra.mxu0 %v275_v12  ;;  %v214_v20 = vstv %s236_s16  ;;  %v210_v23 = vstv %s235_s17 }
  0x17   :  { %282 = vmatpush3.bf16.msra.mxu1 %v281_v13  ;;  %v207_v19 = vstv %s206_s2  ;;  %v217_v24 = vstv %s237_s18 }
  0x19   :  { %258 = vmatmul.mubr.msk.f32.vlgmr.msra.gmra.mrb[0].mxu0 %vm45_vm1, %v33_v14 }
  0x1a   :  { %269 = vmatmul.mubr.msk.f32.vlgmr.msra.gmra.mrb[0].mxu1 %vm45_vm1, %v231_v15 }
  0xec   :  { %v115_v18 = vpop.f32.mrb[0].mxu0 }
  0xed   :  { %v116_v21 = vadd.f32 %v229_v16, %v115_v18  ;;  %v202_v22 = vpop.f32.mrb[0].mxu1  ;;  %v259_v25 = vpop.f32.mrb[1].mxu0 }
  0xee   :  { %v203_v26 = vadd.f32 %v233_v17, %v202_v22  ;;  %v270_v27 = vpop.f32.mrb[1].mxu1 }
  0xef   :  { %v208_v28 = vmul.f32 %v207_v19, %v116_v21  ;;  %v215_v29 = vmul.f32 %v214_v20, %v116_v21 }
  0xf0   :  { %v211_v30 = vmul.f32 %v210_v23, %v203_v26  ;;  %v218_v31 = vmul.f32 %v217_v24, %v203_v26 }
  0xf2   :  { %v212_v32 = vadd.f32 %v211_v30, %v208_v28  ;;  %v219_v33 = vadd.f32 %v218_v31, %v215_v29 }
  0xf4   :  { %221 = vst.msk [vmem:[%s385_s5] sm:$0x3] %vm220_vm2, %v212_v32  ;;  %238 = vst.msk [vmem:[%s385_s5 + $0x2] sm:$0x3] %vm220_vm2, %v219_v33 }
  0xf5   :  { %228 = vsyncpa [#allocation3], 1 }

// kernel: cross_stitch_forward.10
= control target key start
LH: loop header
LB: loop body
LE: loop exit
PB: predicated region body
PF: predicated region fallthrough
CT: control target
= control target key end

     0   :  { %10 = vsyncpa [#allocation3], 0  ;;  %s705_s0 = inlined_call_operand.vmem [shape: f32[2,2,256], index: 0, kind: input, shape index: {}]   ;;  %s706_s1 = inlined_call_operand.vmem [shape: f32[256,32], index: 1, kind: input, shape index: {}]   ;;  %s707_s2 = inlined_call_operand.vmem [shape: f32[256,32], index: 2, kind: input, shape index: {}]   ;;  %s708_s3 = inlined_call_operand.vmem [shape: f32[2,1,32], index: 3, kind: input, shape index: {}]   ;;  %s709_s4 = inlined_call_operand.vmem [shape: f32[4], index: 4, kind: input, shape index: {}]   ;;  %s710_s5 = inlined_call_operand.vmem [shape: f32[2,2,32], index: 5, kind: output, shape index: {}]  }
   0x1   :  { %s25_s20 = sshll.u32 %s709_s4, 4  ;;  %s26_s20 = int_to_ptr.vmem [resolvable:$true] %s25_s20 }
   0x2   :  { %s447_s21 = scalar_lea.vmem %s26_s20, 16  ;;  %p452_p1 = scmp.lt.s32.totalorder %s26_s20, %s26_s20 }
   0x3   :  { %p448_p0 = scmp.ne.s32.totalorder %s26_s20, %s447_s21  ;;  %p453_p2 = scmp.lt.s32.totalorder %s447_s21, %s447_s21 }
   0x5   :  { %p454_p3 = por %p453_p2, %p452_p1 }
   0x7   :  { %p455_p4 = pnand %p454_p3, %p448_p0 }
   0x9   :  { %458 = shalt.err (!%p455_p4)
}
   0xa   :  { %s461_s22 = smov [#allocation2]  }
   0xb   :  { %28 = dma.vmem_to_smem %s26_s20, 16, %s461_s22, [#allocation3]  }
   0xc   :  { %459 = dma.done.wait [#allocation3], 16  }
   0xd   :  { %460 = vsyncadd [#allocation3], 4294967280 }
   0xe   :  { %32 = sfence }
   0xf   :  { %v50_v0 = vld [vmem:[%s706_s1 + $0x80] sm:$0xff]  ;;  %v51_v1 = vld [vmem:[%s706_s1 + $0x88] sm:$0xff]  ;;  %v52_v11 = vld [vmem:[%s706_s1 + $0x90] sm:$0xff]  ;;  %s309_s24 = sld [smem:[#allocation2 + $0x2]]  ;;  %s308_s25 = sld [smem:[#allocation2 + $0x1]]  ;;  %vm293_vm0 = vcmask 254976  }
  0x10   :  { %v172_v2 = vld [vmem:[%s707_s2 + $0x80] sm:$0xff]  ;;  %v382_v3 = vpack.c.bf16 %v51_v1, %v50_v0  ;;  %v173_v4 = vld [vmem:[%s707_s2 + $0x88] sm:$0xff]  ;;  %v53_v13 = vld [vmem:[%s706_s1 + $0x98] sm:$0xff]  ;;  %s310_s26 = sld [smem:[#allocation2 + $0x3]] }
  0x11   :  { %v34_v5 = vld [vmem:[%s706_s1] sm:$0xff]  ;;  %v35_v6 = vld [vmem:[%s706_s1 + $0x8] sm:$0xff]  ;;  %v414_v7 = vpack.c.bf16 %v173_v4, %v172_v2  ;;  %v174_v14 = vld [vmem:[%s707_s2 + $0x90] sm:$0xff]  ;;  %v386_v16 = vpack.c.bf16 %v53_v13, %v52_v11 }
  0x12   :  { %v384_v8 = vpack.c.bf16 %v35_v6, %v34_v5  ;;  %v156_v9 = vld [vmem:[%s707_s2] sm:$0xff]  ;;  %v157_v10 = vld [vmem:[%s707_s2 + $0x8] sm:$0xff]  ;;  %383 = vmatprep.subr.bf16.mxu0 %v382_v3  ;;  %v175_v15 = vld [vmem:[%s707_s2 + $0x98] sm:$0xff] }
  0x13   :  { %v416_v12 = vpack.c.bf16 %v157_v10, %v156_v9  ;;  %415 = vmatprep.subr.bf16.mxu1 %v414_v7  ;;  %v418_v17 = vpack.c.bf16 %v175_v15, %v174_v14  ;;  %v36_v18 = vld [vmem:[%s706_s1 + $0x10] sm:$0xff]  ;;  %v37_v19 = vld [vmem:[%s706_s1 + $0x18] sm:$0xff]  ;;  %v54_v23 = vld [vmem:[%s706_s1 + $0xa0] sm:$0xff] }
  0x14   :  { %385 = vmatpush3.bf16.msra.mxu0 %v384_v8  ;;  %v158_v20 = vld [vmem:[%s707_s2 + $0x10] sm:$0xff]  ;;  %v388_v21 = vpack.c.bf16 %v37_v19, %v36_v18  ;;  %v159_v22 = vld [vmem:[%s707_s2 + $0x18] sm:$0xff]  ;;  %v55_v24 = vld [vmem:[%s706_s1 + $0xa8] sm:$0xff] }
  0x15   :  { %417 = vmatpush3.bf16.msra.mxu1 %v416_v12  ;;  %387 = vmatprep.subr.bf16.mxu0 %v386_v16  ;;  %v420_v25 = vpack.c.bf16 %v159_v22, %v158_v20  ;;  %v390_v26 = vpack.c.bf16 %v55_v24, %v54_v23  ;;  %v176_v27 = vld [vmem:[%s707_s2 + $0xa0] sm:$0xff]  ;;  %v177_v28 = vld [vmem:[%s707_s2 + $0xa8] sm:$0xff]  ;;  %v56_v35 = vld [vmem:[%s706_s1 + $0xb0] sm:$0xff] }
  0x16   :  { %419 = vmatprep.subr.bf16.mxu1 %v418_v17  ;;  %v38_v29 = vld [vmem:[%s706_s1 + $0x20] sm:$0xff]  ;;  %v422_v30 = vpack.c.bf16 %v177_v28, %v176_v27  ;;  %v39_v31 = vld [vmem:[%s706_s1 + $0x28] sm:$0xff]  ;;  %v57_v36 = vld [vmem:[%s706_s1 + $0xb8] sm:$0xff] }
  0x17   :  { %v160_v32 = vld [vmem:[%s707_s2 + $0x20] sm:$0xff]  ;;  %v161_v33 = vld [vmem:[%s707_s2 + $0x28] sm:$0xff]  ;;  %v392_v34 = vpack.c.bf16 %v39_v31, %v38_v29  ;;  %v178_v37 = vld [vmem:[%s707_s2 + $0xb0] sm:$0xff]  ;;  %v394_v39 = vpack.c.bf16 %v57_v36, %v56_v35 }
  0x18   :  { %389 = vmatpush3.bf16.msra.mxu0 %v388_v21  ;;  %v424_v38 = vpack.c.bf16 %v161_v33, %v160_v32  ;;  %v179_v40 = vld [vmem:[%s707_s2 + $0xb8] sm:$0xff]  ;;  %v40_v41 = vld [vmem:[%s706_s1 + $0x30] sm:$0xff]  ;;  %v58_v46 = vld [vmem:[%s706_s1 + $0xc0] sm:$0xff] }
  0x19   :  { %421 = vmatpush3.bf16.msra.mxu1 %v420_v25  ;;  %391 = vmatprep.subr.bf16.mxu0 %v390_v26  ;;  %v41_v42 = vld [vmem:[%s706_s1 + $0x38] sm:$0xff]  ;;  %v426_v43 = vpack.c.bf16 %v179_v40, %v178_v37  ;;  %v162_v44 = vld [vmem:[%s707_s2 + $0x30] sm:$0xff]  ;;  %v59_v47 = vld [vmem:[%s706_s1 + $0xc8] sm:$0xff] }
  0x1a   :  { %423 = vmatprep.subr.bf16.mxu1 %v422_v30  ;;  %v163_v45 = vld [vmem:[%s707_s2 + $0x38] sm:$0xff]  ;;  %v180_v48 = vld [vmem:[%s707_s2 + $0xc0] sm:$0xff]  ;;  %v181_v49 = vld [vmem:[%s707_s2 + $0xc8] sm:$0xff]  ;;  %v396_v50 = vpack.c.bf16 %v41_v42, %v40_v41  ;;  %v398_v52 = vpack.c.bf16 %v59_v47, %v58_v46  ;;  %v281_v47 = vstv %s308_s25 }
  0x1b   :  { %v428_v51 = vpack.c.bf16 %v163_v45, %v162_v44  ;;  %v42_v53 = vld [vmem:[%s706_s1 + $0x40] sm:$0xff]  ;;  %v43_v54 = vld [vmem:[%s706_s1 + $0x48] sm:$0xff]  ;;  %v430_v56 = vpack.c.bf16 %v181_v49, %v180_v48  ;;  %v60_v58 = vld [vmem:[%s706_s1 + $0xd0] sm:$0xff]  ;;  %v285_v44 = vstv %s309_s24 }
  0x1c   :  { %393 = vmatpush3.bf16.msra.mxu0 %v392_v34  ;;  %v164_v55 = vld [vmem:[%s707_s2 + $0x40] sm:$0xff]  ;;  %v165_v57 = vld [vmem:[%s707_s2 + $0x48] sm:$0xff]  ;;  %v61_v59 = vld [vmem:[%s706_s1 + $0xd8] sm:$0xff]  ;;  %v400_v62 = vpack.c.bf16 %v43_v54, %v42_v53  ;;  %v288_v48 = vstv %s310_s26 }
  0x1d   :  { %425 = vmatpush3.bf16.msra.mxu1 %v424_v38  ;;  %395 = vmatprep.subr.bf16.mxu0 %v394_v39  ;;  %v182_v60 = vld [vmem:[%s707_s2 + $0xd0] sm:$0xff]  ;;  %v183_v61 = vld [vmem:[%s707_s2 + $0xd8] sm:$0xff]  ;;  %v432_v63 = vpack.c.bf16 %v165_v57, %v164_v55  ;;  %v402_v0 = vpack.c.bf16 %v61_v59, %v60_v58  ;;  %v62_v6 = vld [vmem:[%s706_s1 + $0xe0] sm:$0xff] }
  0x1e   :  { %427 = vmatprep.subr.bf16.mxu1 %v426_v43  ;;  %v44_v1 = vld [vmem:[%s706_s1 + $0x50] sm:$0xff]  ;;  %v45_v2 = vld [vmem:[%s706_s1 + $0x58] sm:$0xff]  ;;  %v434_v4 = vpack.c.bf16 %v183_v61, %v182_v60  ;;  %v63_v7 = vld [vmem:[%s706_s1 + $0xe8] sm:$0xff] }
  0x1f   :  { %v166_v3 = vld [vmem:[%s707_s2 + $0x50] sm:$0xff]  ;;  %v167_v5 = vld [vmem:[%s707_s2 + $0x58] sm:$0xff]  ;;  %v184_v8 = vld [vmem:[%s707_s2 + $0xe0] sm:$0xff]  ;;  %v404_v10 = vpack.c.bf16 %v45_v2, %v44_v1  ;;  %v406_v14 = vpack.c.bf16 %v63_v7, %v62_v6 }
  0x20   :  { %397 = vmatpush3.bf16.msra.mxu0 %v396_v50  ;;  %v185_v9 = vld [vmem:[%s707_s2 + $0xe8] sm:$0xff]  ;;  %v46_v11 = vld [vmem:[%s706_s1 + $0x60] sm:$0xff]  ;;  %v436_v13 = vpack.c.bf16 %v167_v5, %v166_v3  ;;  %v64_v19 = vld [vmem:[%s706_s1 + $0xf0] sm:$0xff] }
  0x21   :  { %429 = vmatpush3.bf16.msra.mxu1 %v428_v51  ;;  %399 = vmatprep.subr.bf16.mxu0 %v398_v52  ;;  %v47_v12 = vld [vmem:[%s706_s1 + $0x68] sm:$0xff]  ;;  %v168_v15 = vld [vmem:[%s707_s2 + $0x60] sm:$0xff]  ;;  %v438_v18 = vpack.c.bf16 %v185_v9, %v184_v8  ;;  %v65_v20 = vld [vmem:[%s706_s1 + $0xf8] sm:$0xff] }
  0x22   :  { %431 = vmatprep.subr.bf16.mxu1 %v430_v56  ;;  %v169_v16 = vld [vmem:[%s707_s2 + $0x68] sm:$0xff]  ;;  %v303_v17 = vld.sshfl [vmem:[%s705_s0] sm:$0x33 pattern:$0x76325410]  ;;  %v186_v23 = vld [vmem:[%s707_s2 + $0xf0] sm:$0xff]  ;;  %v408_v26 = vpack.c.bf16 %v47_v12, %v46_v11  ;;  %v410_v28 = vpack.c.bf16 %v65_v20, %v64_v19 }
  0x23   :  { %v81_v21 = vcombine.high %v303_v17, %v303_v17  ;;  %v307_v22 = vld.sshfl [vmem:[%s705_s0 + $0x4] sm:$0x33 pattern:$0x76325410]  ;;  %v187_v24 = vld [vmem:[%s707_s2 + $0xf8] sm:$0xff]  ;;  %v440_v27 = vpack.c.bf16 %v169_v16, %v168_v15  ;;  %v48_v29 = vld [vmem:[%s706_s1 + $0x70] sm:$0xff] }
  0x24   :  { %401 = vmatpush3.bf16.msra.mxu0 %v400_v62  ;;  %v204_v25 = vcombine.high %v307_v22, %v307_v22  ;;  %v49_v30 = vld [vmem:[%s706_s1 + $0x78] sm:$0xff]  ;;  %v442_v31 = vpack.c.bf16 %v187_v24, %v186_v23  ;;  %v170_v32 = vld [vmem:[%s707_s2 + $0x70] sm:$0xff]  ;;  %s277_s1 = sld [smem:[#allocation2]]  ;;  %v302_v38 = vld [vmem:[%s708_s3] ss:$0 sm:$0xff] }
  0x25   :  { %433 = vmatpush3.bf16.msra.mxu1 %v432_v63  ;;  %403 = vmatprep.subr.bf16.mxu0 %v402_v0  ;;  %v171_v33 = vld [vmem:[%s707_s2 + $0x78] sm:$0xff]  ;;  %v412_v34 = vpack.c.bf16 %v49_v30, %v48_v29  ;;  %v306_v41 = vld [vmem:[%s708_s3 + $0x1] ss:$0 sm:$0xff] }
  0x26   :  { %435 = vmatprep.subr.bf16.mxu1 %v434_v4  ;;  %148 = vmatprep.mubr.f32.mxu0 %v81_v21  ;;  %v444_v35 = vpack.c.bf16 %v171_v33, %v170_v32 }
  0x27   :  { %271 = vmatprep.mubr.f32.mxu1 %v204_v25 }
  0x28   :  { %405 = vmatpush3.bf16.msra.mxu0 %v404_v10 }
  0x29   :  { %437 = vmatpush3.bf16.msra.mxu1 %v436_v13  ;;  %407 = vmatprep.subr.bf16.mxu0 %v406_v14 }
  0x2a   :  { %439 = vmatprep.subr.bf16.mxu1 %v438_v18  ;;  %v278_v43 = vstv %s277_s1 }
  0x2c   :  { %409 = vmatpush3.bf16.msra.mxu0 %v408_v26 }
  0x2d   :  { %441 = vmatpush3.bf16.msra.mxu1 %v440_v27  ;;  %411 = vmatprep.subr.bf16.mxu0 %v410_v28 }
  0x2e   :  { %443 = vmatprep.subr.bf16.mxu1 %v442_v31 }
  0x30   :  { %413 = vmatpush3.bf16.msra.mxu0 %v412_v34 }
  0x31   :  { %445 = vmatpush3.bf16.msra.mxu1 %v444_v35 }
  0x33   :  { %149 = vmatmul.mubr.f32.vlgmr.msra.gmra.mrb[0].mxu0 %v303_v17 }
  0x34   :  { %272 = vmatmul.mubr.f32.vlgmr.msra.gmra.mrb[0].mxu1 %v307_v22 }
 0x106   :  { %v344_v36 = vpop.f32.mrb[0].mxu0 }
 0x107   :  { %v379_v37 = vpop.f32.mrb[0].mxu1  ;;  %v345_v39 = vpop.f32.mrb[1].mxu0 }
 0x108   :  { %v346_v40 = vadd.f32 %v345_v39, %v344_v36  ;;  %v380_v42 = vpop.f32.mrb[1].mxu1 }
 0x109   :  { %v381_v45 = vadd.f32 %v380_v42, %v379_v37 }
 0x10a   :  { %v151_v46 = vadd.f32 %v346_v40, %v302_v38 }
 0x10b   :  { %v274_v49 = vadd.f32 %v381_v45, %v306_v41 }
 0x10c   :  { %v279_v50 = vmul.f32 %v278_v43, %v151_v46  ;;  %v286_v51 = vmul.f32 %v285_v44, %v151_v46 }
 0x10d   :  { %v282_v52 = vmul.f32 %v281_v47, %v274_v49  ;;  %v289_v53 = vmul.f32 %v288_v48, %v274_v49 }
 0x10f   :  { %v283_v54 = vadd.f32 %v282_v52, %v279_v50  ;;  %v290_v55 = vadd.f32 %v289_v53, %v286_v51 }
 0x111   :  { %v291_v56 = vmax.f32 %v283_v54, 0.0  ;;  %v292_v57 = vmax.f32 %v290_v55, 0.0 }
 0x113   :  { %294 = vst.msk [vmem:[%s710_s5] sm:$0x3] %vm293_vm0, %v291_v56  ;;  %311 = vst.msk [vmem:[%s710_s5 + $0x2] sm:$0x3] %vm293_vm0, %v292_v57 }
 0x114   :  { %301 = vsyncpa [#allocation3], 1 }

</bundles_post_ra>
